<compile_context>
chip_gen: v7x
topology: tpu7x:2x2x1
jax: 0.10.0
libtpu: 0.0.40
codegen_flags: <defaults>
</compile_context>

<pallas_src>
import functools

import jax
import jax.numpy as jnp
from jax import lax
from jax.experimental import pallas as pl
from jax.experimental.pallas import tpu as pltpu

LEAKY_SLOPE = 0.01  # ABN default activation: leaky_relu(slope=0.01)
EPS = 1e-5
LANE = 128


def _leaky(x):
    return jnp.where(x >= 0, x, LEAKY_SLOPE * x)


def _round_up(x, m):
    return (x + m - 1) // m * m


# ----------------------------------------------------------------------------
# Fused per-layer kernel:
#   x    : (1, H, W, Cin_pad)   bf16   (channel-padded dense-block features)
#   s1,b1: (1, Cin_pad)         f32    (folded ABN over input channels)
#   w1   : (Cin_pad, Cmid_pad)  bf16   (1x1 conv)
#   s2,b2: (1, Cmid_pad)        f32    (folded ABN over bottleneck channels)
#   w3   : (9, Cmid_pad, Cout_pad) bf16 (3x3 conv taps, ky-major)
#   out  : (1, H, W, Cout_pad)  bf16
# Scratch:
#   mid_ref: VMEM (H+2d, W+2d, Cmid_pad) f32  -- zero halo for the 3x3 conv
#   acc_ref: VMEM (H*W, Cout_pad)        f32  -- conv accumulator
# ----------------------------------------------------------------------------
def _dense_layer_kernel(x_ref, s1_ref, b1_ref, w1_ref, s2_ref, b2_ref, w3_ref,
                        o_ref, mid_ref, acc_ref, *, H, W, d, hc):
    cinp = x_ref.shape[-1]
    cmidp = mid_ref.shape[-1]

    # The 3x3 halo of `mid` must be exact zeros (conv pads `mid`, not `x`).
    mid_ref[...] = jnp.zeros_like(mid_ref)

    # Stage 1: BN1 + leaky -> 1x1 conv (MXU, bf16 x bf16 -> f32) -> BN2 + leaky
    # Row-chunked so the live traced values stay vreg-sized.
    for h0 in range(0, H, hc):
        xs = x_ref[:, h0:h0 + hc]                       # (1, hc, W, cinp) bf16
        y = _leaky(xs.reshape(hc * W, cinp) * s1_ref[...] + b1_ref[...])
        z = jnp.dot(y.astype(jnp.bfloat16), w1_ref[...],
                    preferred_element_type=jnp.float32)
        m = _leaky(z * s2_ref[...] + b2_ref[...])
        mid_ref[d + h0:d + h0 + hc, d:d + W, :] = m.reshape(hc, W, cmidp)

    # Stage 2: 3x3 dilated conv as 9 shifted-window matmuls (K = Cmid_pad = 128),
    # accumulating into a VMEM scratch (not a vreg-resident traced value).
    acc_ref[...] = jnp.zeros_like(acc_ref)
    for ky in range(3):
        for kx in range(3):
            tap = mid_ref[ky * d:ky * d + H, kx * d:kx * d + W, :]
            acc_ref[...] += jnp.dot(
                tap.reshape(H * W, cmidp).astype(jnp.bfloat16),
                w3_ref[ky * 3 + kx],
                preferred_element_type=jnp.float32)

    # Lane-dense (Cout_pad = 128) unmasked store.
    o_ref[...] = acc_ref[...].reshape(1, H, W, -1).astype(o_ref.dtype)


def _dense_layer(feats, lp, *, H, W, dilation):
    N = feats.shape[0]
    cinp = feats.shape[-1]
    cmidp = lp["w1"].shape[-1]
    coutp = lp["w3"].shape[-1]
    assert lp["w1"].shape[0] == cinp
    d = dilation

    # Row-chunk size for the 1x1 stage: ~128 matmul rows per MXU call.
    hc = max(1, min(H, max(1, 128 // max(W, 1))))
    while H % hc:
        hc -= 1

    kern = functools.partial(_dense_layer_kernel, H=H, W=W, d=d, hc=hc)
    return pl.pallas_call(
        kern,
        out_shape=jax.ShapeDtypeStruct((N, H, W, coutp), jnp.bfloat16),
        grid_spec=pltpu.PrefetchScalarGridSpec(
            num_scalar_prefetch=0,
            grid=(N,),
            in_specs=[
                pl.BlockSpec((1, H, W, cinp), lambda n: (n, 0, 0, 0)),
                pl.BlockSpec((1, cinp), lambda n: (0, 0)),
                pl.BlockSpec((1, cinp), lambda n: (0, 0)),
                pl.BlockSpec((cinp, cmidp), lambda n: (0, 0)),
                pl.BlockSpec((1, cmidp), lambda n: (0, 0)),
                pl.BlockSpec((1, cmidp), lambda n: (0, 0)),
                pl.BlockSpec((9, cmidp, coutp), lambda n: (0, 0, 0)),
            ],
            out_specs=pl.BlockSpec((1, H, W, coutp), lambda n: (n, 0, 0, 0)),
            scratch_shapes=[
                pltpu.VMEM((H + 2 * d, W + 2 * d, cmidp), jnp.float32),
                pltpu.VMEM((H * W, coutp), jnp.float32),
            ],
        ),
        compiler_params=pltpu.CompilerParams(
            dimension_semantics=("parallel",),
            vmem_limit_bytes=32 * 1024 * 1024,
        ),
    )(feats, lp["scale1"], lp["shift1"], lp["w1"],
      lp["scale2"], lp["shift2"], lp["w3"])


# ----------------------------------------------------------------------------
# DenseModule forward
# ----------------------------------------------------------------------------
@functools.partial(jax.jit, static_argnames=("growth", "layers", "dilation"))
def dense_module_forward(x_nchw, padded_params, growth, layers, dilation=1):
    x = jnp.transpose(x_nchw, (0, 2, 3, 1))           # NCHW -> NHWC
    N, H, W, c0 = x.shape
    ctot = c0 + growth * layers
    cpad = _round_up(ctot, LANE)

    # Single channel-padded feature buffer replaces the per-layer torch.cat.
    feats = jnp.zeros((N, H, W, cpad), jnp.bfloat16)
    feats = feats.at[:, :, :, :c0].set(x.astype(jnp.bfloat16))

    cin = c0
    for i in range(layers):
        out = _dense_layer(feats, padded_params[i], H=H, W=W, dilation=dilation)
        feats = feats.at[:, :, :, cin:cin + growth].set(out[..., :growth])
        cin += growth

    y = feats[..., :ctot].astype(jnp.float32)
    return jnp.transpose(y, (0, 3, 1, 2))             # NHWC -> NCHW


# ----------------------------------------------------------------------------
# Deterministic parameter init (synthetic — no checkpoint), raw (unpadded) f32
# ----------------------------------------------------------------------------
def init_params(key, in_channels, growth, layers, bottleneck_factor=4):
    params = []
    cin = in_channels
    cmid = growth * bottleneck_factor
    for i in range(layers):
        ks = jax.random.split(jax.random.fold_in(key, i), 10)
        g1 = 1.0 + 0.1 * jax.random.normal(ks[0], (cin,))
        b1 = 0.1 * jax.random.normal(ks[1], (cin,))
        m1 = 0.1 * jax.random.normal(ks[2], (cin,))
        v1 = jax.nn.softplus(jax.random.normal(ks[3], (cin,))) + 0.5
        w1 = jax.random.normal(ks[4], (cin, cmid)) / jnp.sqrt(cin)
        g2 = 1.0 + 0.1 * jax.random.normal(ks[5], (cmid,))
        b2 = 0.1 * jax.random.normal(ks[6], (cmid,))
        m2 = 0.1 * jax.random.normal(ks[7], (cmid,))
        v2 = jax.nn.softplus(jax.random.normal(ks[8], (cmid,))) + 0.5
        w3 = jax.random.normal(ks[9], (9, cmid, growth)) / jnp.sqrt(9.0 * cmid)

        scale1 = g1 / jnp.sqrt(v1 + EPS)
        shift1 = b1 - m1 * scale1
        scale2 = g2 / jnp.sqrt(v2 + EPS)
        shift2 = b2 - m2 * scale2
        params.append(dict(
            scale1=scale1.astype(jnp.float32), shift1=shift1.astype(jnp.float32),
            w1=w1.astype(jnp.float32),
            scale2=scale2.astype(jnp.float32), shift2=shift2.astype(jnp.float32),
            w3=w3.astype(jnp.float32)))
        cin += growth
    return params


def pad_params(raw_params, in_channels, growth, layers):
    """Zero-pad every channel dim to a multiple of 128; cast weights to bf16."""
    ctot = in_channels + growth * layers
    cpad = _round_up(ctot, LANE)
    cmid = int(raw_params[0]["w1"].shape[1])
    mpad = _round_up(cmid, LANE)
    opad = _round_up(growth, LANE)
    padded = []
    cin = in_channels
    for p in raw_params:
        s1 = jnp.zeros((1, cpad), jnp.float32).at[0, :cin].set(p["scale1"])
        b1 = jnp.zeros((1, cpad), jnp.float32).at[0, :cin].set(p["shift1"])
        w1 = jnp.zeros((cpad, mpad), jnp.float32).at[:cin, :cmid].set(p["w1"])
        s2 = jnp.zeros((1, mpad), jnp.float32).at[0, :cmid].set(p["scale2"])
        b2 = jnp.zeros((1, mpad), jnp.float32).at[0, :cmid].set(p["shift2"])
        w3 = jnp.zeros((9, mpad, opad), jnp.float32).at[:, :cmid, :growth].set(p["w3"])
        padded.append(dict(
            scale1=s1, shift1=b1, w1=w1.astype(jnp.bfloat16),
            scale2=s2, shift2=b2, w3=w3.astype(jnp.bfloat16)))
        cin += growth
    return padded


# ----------------------------------------------------------------------------
# Pure-JAX references.
#  match_bf16=False : exact f32 module semantics (loose check, bf16 data path)
#  match_bf16=True  : quantizes at the same points the kernel does (tight check)
# ----------------------------------------------------------------------------
def reference_forward(x_nchw, raw_params, growth, layers, dilation=1,
                      match_bf16=False):
    if match_bf16:
        cast = lambda a: a.astype(jnp.bfloat16).astype(jnp.float32)
    else:
        cast = lambda a: a
    x = jnp.transpose(x_nchw, (0, 2, 3, 1)).astype(jnp.float32)
    feats = [cast(x)]
    for p in raw_params:
        xc = jnp.concatenate(feats, axis=-1)
        y = cast(_leaky(xc * p["scale1"] + p["shift1"]))
        z = jnp.einsum("nhwc,co->nhwo", y, cast(p["w1"]))
        m = cast(_leaky(z * p["scale2"] + p["shift2"]))
        w3 = cast(p["w3"]).reshape(3, 3, -1, growth)
        out = lax.conv_general_dilated(
            m, w3, window_strides=(1, 1),
            padding=[(dilation, dilation), (dilation, dilation)],
            rhs_dilation=(dilation, dilation),
            dimension_numbers=("NHWC", "HWIO", "NHWC"))
        feats.append(cast(out))
    return jnp.transpose(jnp.concatenate(feats, axis=-1), (0, 3, 1, 2))


if __name__ == "__main__":
    in_channels, growth, layers, dilation = 8, 4, 2, 1
    N, H, W = 2, 16, 16

    key = jax.random.PRNGKey(0)
    kx, kp = jax.random.split(key)
    x = jax.random.normal(kx, (N, in_channels, H, W), dtype=jnp.float32)  # NCHW
    raw_params = init_params(kp, in_channels, growth, layers)
    padded_params = pad_params(raw_params, in_channels, growth, layers)

    out = dense_module_forward(x, padded_params, growth=growth, layers=layers,
                               dilation=dilation)
    out = jax.block_until_ready(out)

    expected_channels = in_channels + growth * layers
    assert out.shape == (N, expected_channels, H, W), out.shape

    # Tight check vs a reference that quantizes to bf16 at the same points.
    ref_m = reference_forward(x, raw_params, growth, layers, dilation,
                              match_bf16=True)
    err_m = float(jnp.max(jnp.abs(out - ref_m)))
    assert jnp.allclose(out, ref_m, atol=2e-2, rtol=2e-2), err_m

    # Loose check vs pure-f32 module semantics (bf16 data path tolerance).
    ref_f = reference_forward(x, raw_params, growth, layers, dilation,
                              match_bf16=False)
    err_f = float(jnp.max(jnp.abs(out - ref_f)))
    assert jnp.allclose(out, ref_f, atol=1e-1, rtol=1e-1), err_f

    print("KERNEL_OK")
</pallas_src>

<mosaic_0001>
module attributes {stable_mosaic.version = 11 : i64} {
  func.func @_dense_layer_kernel(%arg0: i32, %arg1: memref<1x16x16x128xbf16, #tpu.memory_space<vmem>>, %arg2: memref<1x128xf32, #tpu.memory_space<vmem>>, %arg3: memref<1x128xf32, #tpu.memory_space<vmem>>, %arg4: memref<128x128xbf16, #tpu.memory_space<vmem>>, %arg5: memref<1x128xf32, #tpu.memory_space<vmem>>, %arg6: memref<1x128xf32, #tpu.memory_space<vmem>>, %arg7: memref<9x128x128xbf16, #tpu.memory_space<vmem>>, %arg8: memref<1x16x16x128xbf16, #tpu.memory_space<vmem>>, %arg9: memref<18x18x128xf32, #tpu.memory_space<vmem>>, %arg10: memref<256x128xf32, #tpu.memory_space<vmem>>) attributes {dimension_semantics = [#tpu.dimension_semantics<parallel>], iteration_bounds = array<i64: 2>, scalar_prefetch = 0 : i64, scratch_operands = 2 : i64, tpu.core_type = #tpu.core_type<tc>, window_params = [{transform_indices = @transform_0, window_bounds = array<i64: 1, 16, 16, 128>}, {pipeline_mode = #tpu.pipeline_mode<synchronous>, transform_indices = @transform_1, window_bounds = array<i64: 1, 128>}, {pipeline_mode = #tpu.pipeline_mode<synchronous>, transform_indices = @transform_2, window_bounds = array<i64: 1, 128>}, {pipeline_mode = #tpu.pipeline_mode<synchronous>, transform_indices = @transform_3, window_bounds = array<i64: 128, 128>}, {pipeline_mode = #tpu.pipeline_mode<synchronous>, transform_indices = @transform_4, window_bounds = array<i64: 1, 128>}, {pipeline_mode = #tpu.pipeline_mode<synchronous>, transform_indices = @transform_5, window_bounds = array<i64: 1, 128>}, {pipeline_mode = #tpu.pipeline_mode<synchronous>, transform_indices = @transform_6, window_bounds = array<i64: 9, 128, 128>}, {transform_indices = @transform_7, window_bounds = array<i64: 1, 16, 16, 128>}]} {
    %cst = arith.constant 0.000000e+00 : f32
    %0 = vector.broadcast %cst : f32 to vector<18x18x128xf32>
    %c0 = arith.constant 0 : index
    %c0_0 = arith.constant 0 : index
    %c0_1 = arith.constant 0 : index
    %1 = vector.load %arg9[%c0, %c0_0, %c0_1] : memref<18x18x128xf32, #tpu.memory_space<vmem>>, vector<18x18x128xf32>
    tpu.vector_store %arg9[%c0, %c0_0, %c0_1], %0 {strides = array<i32>} : memref<18x18x128xf32, #tpu.memory_space<vmem>>, vector<18x18x128xf32>,
    %c0_2 = arith.constant 0 : index
    %c0_3 = arith.constant 0 : index
    %c0_4 = arith.constant 0 : index
    %c0_5 = arith.constant 0 : index
    %2 = vector.load %arg1[%c0_2, %c0_3, %c0_4, %c0_5] : memref<1x16x16x128xbf16, #tpu.memory_space<vmem>>, vector<1x8x16x128xbf16>
    %3 = vector.shape_cast %2 : vector<1x8x16x128xbf16> to vector<128x128xbf16>
    %c0_6 = arith.constant 0 : index
    %c0_7 = arith.constant 0 : index
    %4 = vector.load %arg2[%c0_6, %c0_7] : memref<1x128xf32, #tpu.memory_space<vmem>>, vector<1x128xf32>
    %5 = arith.extf %3 : vector<128x128xbf16> to vector<128x128xf32>
    %6 = vector.broadcast %4 : vector<1x128xf32> to vector<128x128xf32>
    %7 = arith.mulf %5, %6 : vector<128x128xf32>
    %c0_8 = arith.constant 0 : index
    %c0_9 = arith.constant 0 : index
    %8 = vector.load %arg3[%c0_8, %c0_9] : memref<1x128xf32, #tpu.memory_space<vmem>>, vector<1x128xf32>
    %9 = vector.broadcast %8 : vector<1x128xf32> to vector<128x128xf32>
    %10 = arith.addf %7, %9 : vector<128x128xf32>
    %cst_10 = arith.constant 0.000000e+00 : f32
    %11 = vector.broadcast %cst_10 : f32 to vector<128x128xf32>
    %12 = arith.cmpf oge, %10, %11 : vector<128x128xf32>
    %cst_11 = arith.constant 0.00999999977 : f32
    %13 = vector.broadcast %cst_11 : f32 to vector<128x128xf32>
    %14 = arith.mulf %13, %10 : vector<128x128xf32>
    %15 = arith.select %12, %10, %14 : vector<128x128xi1>, vector<128x128xf32>
    %16 = arith.truncf %15 : vector<128x128xf32> to vector<128x128xbf16>
    %c0_12 = arith.constant 0 : index
    %c0_13 = arith.constant 0 : index
    %17 = vector.load %arg4[%c0_12, %c0_13] : memref<128x128xbf16, #tpu.memory_space<vmem>>, vector<128x128xbf16>
    %cst_14 = arith.constant dense<0.000000e+00> : vector<128x128xf32>
    %18 = tpu.matmul %16, %17, %cst_14 {dimension_numbers = #tpu.dot_dimension_numbers<[1], [0], [0], [1], [0, 0, 1, 1], [], []>} : vector<128x128xbf16>, vector<128x128xbf16>, vector<128x128xf32> -> vector<128x128xf32>
    %c0_15 = arith.constant 0 : index
    %c0_16 = arith.constant 0 : index
    %19 = vector.load %arg5[%c0_15, %c0_16] : memref<1x128xf32, #tpu.memory_space<vmem>>, vector<1x128xf32>
    %20 = vector.broadcast %19 : vector<1x128xf32> to vector<128x128xf32>
    %21 = arith.mulf %18, %20 : vector<128x128xf32>
    %c0_17 = arith.constant 0 : index
    %c0_18 = arith.constant 0 : index
    %22 = vector.load %arg6[%c0_17, %c0_18] : memref<1x128xf32, #tpu.memory_space<vmem>>, vector<1x128xf32>
    %23 = vector.broadcast %22 : vector<1x128xf32> to vector<128x128xf32>
    %24 = arith.addf %21, %23 : vector<128x128xf32>
    %cst_19 = arith.constant 0.000000e+00 : f32
    %25 = vector.broadcast %cst_19 : f32 to vector<128x128xf32>
    %26 = arith.cmpf oge, %24, %25 : vector<128x128xf32>
    %cst_20 = arith.constant 0.00999999977 : f32
    %27 = vector.broadcast %cst_20 : f32 to vector<128x128xf32>
    %28 = arith.mulf %27, %24 : vector<128x128xf32>
    %29 = arith.select %26, %24, %28 : vector<128x128xi1>, vector<128x128xf32>
    %30 = vector.shape_cast %29 : vector<128x128xf32> to vector<8x16x128xf32>
    %c1 = arith.constant 1 : index
    %c1_21 = arith.constant 1 : index
    %c0_22 = arith.constant 0 : index
    %31 = vector.load %arg9[%c1, %c1_21, %c0_22] : memref<18x18x128xf32, #tpu.memory_space<vmem>>, vector<8x16x128xf32>
    tpu.vector_store %arg9[%c1, %c1_21, %c0_22], %30 {strides = array<i32>} : memref<18x18x128xf32, #tpu.memory_space<vmem>>, vector<8x16x128xf32>,
    %c0_23 = arith.constant 0 : index
    %c8 = arith.constant 8 : index
    %c0_24 = arith.constant 0 : index
    %c0_25 = arith.constant 0 : index
    %32 = vector.load %arg1[%c0_23, %c8, %c0_24, %c0_25] : memref<1x16x16x128xbf16, #tpu.memory_space<vmem>>, vector<1x8x16x128xbf16>
    %33 = vector.shape_cast %32 : vector<1x8x16x128xbf16> to vector<128x128xbf16>
    %c0_26 = arith.constant 0 : index
    %c0_27 = arith.constant 0 : index
    %34 = vector.load %arg2[%c0_26, %c0_27] : memref<1x128xf32, #tpu.memory_space<vmem>>, vector<1x128xf32>
    %35 = arith.extf %33 : vector<128x128xbf16> to vector<128x128xf32>
    %36 = vector.broadcast %34 : vector<1x128xf32> to vector<128x128xf32>
    %37 = arith.mulf %35, %36 : vector<128x128xf32>
    %c0_28 = arith.constant 0 : index
    %c0_29 = arith.constant 0 : index
    %38 = vector.load %arg3[%c0_28, %c0_29] : memref<1x128xf32, #tpu.memory_space<vmem>>, vector<1x128xf32>
    %39 = vector.broadcast %38 : vector<1x128xf32> to vector<128x128xf32>
    %40 = arith.addf %37, %39 : vector<128x128xf32>
    %cst_30 = arith.constant 0.000000e+00 : f32
    %41 = vector.broadcast %cst_30 : f32 to vector<128x128xf32>
    %42 = arith.cmpf oge, %40, %41 : vector<128x128xf32>
    %cst_31 = arith.constant 0.00999999977 : f32
    %43 = vector.broadcast %cst_31 : f32 to vector<128x128xf32>
    %44 = arith.mulf %43, %40 : vector<128x128xf32>
    %45 = arith.select %42, %40, %44 : vector<128x128xi1>, vector<128x128xf32>
    %46 = arith.truncf %45 : vector<128x128xf32> to vector<128x128xbf16>
    %c0_32 = arith.constant 0 : index
    %c0_33 = arith.constant 0 : index
    %47 = vector.load %arg4[%c0_32, %c0_33] : memref<128x128xbf16, #tpu.memory_space<vmem>>, vector<128x128xbf16>
    %cst_34 = arith.constant dense<0.000000e+00> : vector<128x128xf32>
    %48 = tpu.matmul %46, %47, %cst_34 {dimension_numbers = #tpu.dot_dimension_numbers<[1], [0], [0], [1], [0, 0, 1, 1], [], []>} : vector<128x128xbf16>, vector<128x128xbf16>, vector<128x128xf32> -> vector<128x128xf32>
    %c0_35 = arith.constant 0 : index
    %c0_36 = arith.constant 0 : index
    %49 = vector.load %arg5[%c0_35, %c0_36] : memref<1x128xf32, #tpu.memory_space<vmem>>, vector<1x128xf32>
    %50 = vector.broadcast %49 : vector<1x128xf32> to vector<128x128xf32>
    %51 = arith.mulf %48, %50 : vector<128x128xf32>
    %c0_37 = arith.constant 0 : index
    %c0_38 = arith.constant 0 : index
    %52 = vector.load %arg6[%c0_37, %c0_38] : memref<1x128xf32, #tpu.memory_space<vmem>>, vector<1x128xf32>
    %53 = vector.broadcast %52 : vector<1x128xf32> to vector<128x128xf32>
    %54 = arith.addf %51, %53 : vector<128x128xf32>
    %cst_39 = arith.constant 0.000000e+00 : f32
    %55 = vector.broadcast %cst_39 : f32 to vector<128x128xf32>
    %56 = arith.cmpf oge, %54, %55 : vector<128x128xf32>
    %cst_40 = arith.constant 0.00999999977 : f32
    %57 = vector.broadcast %cst_40 : f32 to vector<128x128xf32>
    %58 = arith.mulf %57, %54 : vector<128x128xf32>
    %59 = arith.select %56, %54, %58 : vector<128x128xi1>, vector<128x128xf32>
    %60 = vector.shape_cast %59 : vector<128x128xf32> to vector<8x16x128xf32>
    %c9 = arith.constant 9 : index
    %c1_41 = arith.constant 1 : index
    %c0_42 = arith.constant 0 : index
    %61 = vector.load %arg9[%c9, %c1_41, %c0_42] : memref<18x18x128xf32, #tpu.memory_space<vmem>>, vector<8x16x128xf32>
    tpu.vector_store %arg9[%c9, %c1_41, %c0_42], %60 {strides = array<i32>} : memref<18x18x128xf32, #tpu.memory_space<vmem>>, vector<8x16x128xf32>,
    %cst_43 = arith.constant 0.000000e+00 : f32
    %62 = vector.broadcast %cst_43 : f32 to vector<256x128xf32>
    %c0_44 = arith.constant 0 : index
    %c0_45 = arith.constant 0 : index
    %63 = vector.load %arg10[%c0_44, %c0_45] : memref<256x128xf32, #tpu.memory_space<vmem>>, vector<256x128xf32>
    tpu.vector_store %arg10[%c0_44, %c0_45], %62 {strides = array<i32>} : memref<256x128xf32, #tpu.memory_space<vmem>>, vector<256x128xf32>,
    %c0_46 = arith.constant 0 : index
    %c0_47 = arith.constant 0 : index
    %c0_48 = arith.constant 0 : index
    %64 = vector.load %arg9[%c0_46, %c0_47, %c0_48] : memref<18x18x128xf32, #tpu.memory_space<vmem>>, vector<16x16x128xf32>
    %c0_49 = arith.constant 0 : index
    %c0_50 = arith.constant 0 : index
    %65 = vector.load %arg10[%c0_49, %c0_50] : memref<256x128xf32, #tpu.memory_space<vmem>>, vector<256x128xf32>
    %66 = vector.shape_cast %64 : vector<16x16x128xf32> to vector<256x128xf32>
    %67 = arith.truncf %66 : vector<256x128xf32> to vector<256x128xbf16>
    %c0_51 = arith.constant 0 : index
    %c0_52 = arith.constant 0 : index
    %c0_53 = arith.constant 0 : index
    %68 = vector.load %arg7[%c0_51, %c0_52, %c0_53] : memref<9x128x128xbf16, #tpu.memory_space<vmem>>, vector<1x128x128xbf16>
    %69 = vector.shape_cast %68 : vector<1x128x128xbf16> to vector<128x128xbf16>
    %cst_54 = arith.constant dense<0.000000e+00> : vector<256x128xf32>
    %70 = tpu.matmul %67, %69, %cst_54 {dimension_numbers = #tpu.dot_dimension_numbers<[1], [0], [0], [1], [0, 0, 1, 1], [], []>} : vector<256x128xbf16>, vector<128x128xbf16>, vector<256x128xf32> -> vector<256x128xf32>
    %71 = arith.addf %65, %70 : vector<256x128xf32>
    %c0_55 = arith.constant 0 : index
    %c0_56 = arith.constant 0 : index
    %72 = vector.load %arg10[%c0_55, %c0_56] : memref<256x128xf32, #tpu.memory_space<vmem>>, vector<256x128xf32>
    tpu.vector_store %arg10[%c0_55, %c0_56], %71 {strides = array<i32>} : memref<256x128xf32, #tpu.memory_space<vmem>>, vector<256x128xf32>,
    %c0_57 = arith.constant 0 : index
    %c1_58 = arith.constant 1 : index
    %c0_59 = arith.constant 0 : index
    %73 = vector.load %arg9[%c0_57, %c1_58, %c0_59] : memref<18x18x128xf32, #tpu.memory_space<vmem>>, vector<16x16x128xf32>
    %c0_60 = arith.constant 0 : index
    %c0_61 = arith.constant 0 : index
    %74 = vector.load %arg10[%c0_60, %c0_61] : memref<256x128xf32, #tpu.memory_space<vmem>>, vector<256x128xf32>
    %75 = vector.shape_cast %73 : vector<16x16x128xf32> to vector<256x128xf32>
    %76 = arith.truncf %75 : vector<256x128xf32> to vector<256x128xbf16>
    %c1_62 = arith.constant 1 : index
    %c0_63 = arith.constant 0 : index
    %c0_64 = arith.constant 0 : index
    %77 = vector.load %arg7[%c1_62, %c0_63, %c0_64] : memref<9x128x128xbf16, #tpu.memory_space<vmem>>, vector<1x128x128xbf16>
    %78 = vector.shape_cast %77 : vector<1x128x128xbf16> to vector<128x128xbf16>
    %cst_65 = arith.constant dense<0.000000e+00> : vector<256x128xf32>
    %79 = tpu.matmul %76, %78, %cst_65 {dimension_numbers = #tpu.dot_dimension_numbers<[1], [0], [0], [1], [0, 0, 1, 1], [], []>} : vector<256x128xbf16>, vector<128x128xbf16>, vector<256x128xf32> -> vector<256x128xf32>
    %80 = arith.addf %74, %79 : vector<256x128xf32>
    %c0_66 = arith.constant 0 : index
    %c0_67 = arith.constant 0 : index
    %81 = vector.load %arg10[%c0_66, %c0_67] : memref<256x128xf32, #tpu.memory_space<vmem>>, vector<256x128xf32>
    tpu.vector_store %arg10[%c0_66, %c0_67], %80 {strides = array<i32>} : memref<256x128xf32, #tpu.memory_space<vmem>>, vector<256x128xf32>,
    %c0_68 = arith.constant 0 : index
    %c2 = arith.constant 2 : index
    %c0_69 = arith.constant 0 : index
    %82 = vector.load %arg9[%c0_68, %c2, %c0_69] : memref<18x18x128xf32, #tpu.memory_space<vmem>>, vector<16x16x128xf32>
    %c0_70 = arith.constant 0 : index
    %c0_71 = arith.constant 0 : index
    %83 = vector.load %arg10[%c0_70, %c0_71] : memref<256x128xf32, #tpu.memory_space<vmem>>, vector<256x128xf32>
    %84 = vector.shape_cast %82 : vector<16x16x128xf32> to vector<256x128xf32>
    %85 = arith.truncf %84 : vector<256x128xf32> to vector<256x128xbf16>
    %c2_72 = arith.constant 2 : index
    %c0_73 = arith.constant 0 : index
    %c0_74 = arith.constant 0 : index
    %86 = vector.load %arg7[%c2_72, %c0_73, %c0_74] : memref<9x128x128xbf16, #tpu.memory_space<vmem>>, vector<1x128x128xbf16>
    %87 = vector.shape_cast %86 : vector<1x128x128xbf16> to vector<128x128xbf16>
    %cst_75 = arith.constant dense<0.000000e+00> : vector<256x128xf32>
    %88 = tpu.matmul %85, %87, %cst_75 {dimension_numbers = #tpu.dot_dimension_numbers<[1], [0], [0], [1], [0, 0, 1, 1], [], []>} : vector<256x128xbf16>, vector<128x128xbf16>, vector<256x128xf32> -> vector<256x128xf32>
    %89 = arith.addf %83, %88 : vector<256x128xf32>
    %c0_76 = arith.constant 0 : index
    %c0_77 = arith.constant 0 : index
    %90 = vector.load %arg10[%c0_76, %c0_77] : memref<256x128xf32, #tpu.memory_space<vmem>>, vector<256x128xf32>
    tpu.vector_store %arg10[%c0_76, %c0_77], %89 {strides = array<i32>} : memref<256x128xf32, #tpu.memory_space<vmem>>, vector<256x128xf32>,
    %c1_78 = arith.constant 1 : index
    %c0_79 = arith.constant 0 : index
    %c0_80 = arith.constant 0 : index
    %91 = vector.load %arg9[%c1_78, %c0_79, %c0_80] : memref<18x18x128xf32, #tpu.memory_space<vmem>>, vector<16x16x128xf32>
    %c0_81 = arith.constant 0 : index
    %c0_82 = arith.constant 0 : index
    %92 = vector.load %arg10[%c0_81, %c0_82] : memref<256x128xf32, #tpu.memory_space<vmem>>, vector<256x128xf32>
    %93 = vector.shape_cast %91 : vector<16x16x128xf32> to vector<256x128xf32>
    %94 = arith.truncf %93 : vector<256x128xf32> to vector<256x128xbf16>
    %c3 = arith.constant 3 : index
    %c0_83 = arith.constant 0 : index
    %c0_84 = arith.constant 0 : index
    %95 = vector.load %arg7[%c3, %c0_83, %c0_84] : memref<9x128x128xbf16, #tpu.memory_space<vmem>>, vector<1x128x128xbf16>
    %96 = vector.shape_cast %95 : vector<1x128x128xbf16> to vector<128x128xbf16>
    %cst_85 = arith.constant dense<0.000000e+00> : vector<256x128xf32>
    %97 = tpu.matmul %94, %96, %cst_85 {dimension_numbers = #tpu.dot_dimension_numbers<[1], [0], [0], [1], [0, 0, 1, 1], [], []>} : vector<256x128xbf16>, vector<128x128xbf16>, vector<256x128xf32> -> vector<256x128xf32>
    %98 = arith.addf %92, %97 : vector<256x128xf32>
    %c0_86 = arith.constant 0 : index
    %c0_87 = arith.constant 0 : index
    %99 = vector.load %arg10[%c0_86, %c0_87] : memref<256x128xf32, #tpu.memory_space<vmem>>, vector<256x128xf32>
    tpu.vector_store %arg10[%c0_86, %c0_87], %98 {strides = array<i32>} : memref<256x128xf32, #tpu.memory_space<vmem>>, vector<256x128xf32>,
    %c1_88 = arith.constant 1 : index
    %c1_89 = arith.constant 1 : index
    %c0_90 = arith.constant 0 : index
    %100 = vector.load %arg9[%c1_88, %c1_89, %c0_90] : memref<18x18x128xf32, #tpu.memory_space<vmem>>, vector<16x16x128xf32>
    %c0_91 = arith.constant 0 : index
    %c0_92 = arith.constant 0 : index
    %101 = vector.load %arg10[%c0_91, %c0_92] : memref<256x128xf32, #tpu.memory_space<vmem>>, vector<256x128xf32>
    %102 = vector.shape_cast %100 : vector<16x16x128xf32> to vector<256x128xf32>
    %103 = arith.truncf %102 : vector<256x128xf32> to vector<256x128xbf16>
    %c4 = arith.constant 4 : index
    %c0_93 = arith.constant 0 : index
    %c0_94 = arith.constant 0 : index
    %104 = vector.load %arg7[%c4, %c0_93, %c0_94] : memref<9x128x128xbf16, #tpu.memory_space<vmem>>, vector<1x128x128xbf16>
    %105 = vector.shape_cast %104 : vector<1x128x128xbf16> to vector<128x128xbf16>
    %cst_95 = arith.constant dense<0.000000e+00> : vector<256x128xf32>
    %106 = tpu.matmul %103, %105, %cst_95 {dimension_numbers = #tpu.dot_dimension_numbers<[1], [0], [0], [1], [0, 0, 1, 1], [], []>} : vector<256x128xbf16>, vector<128x128xbf16>, vector<256x128xf32> -> vector<256x128xf32>
    %107 = arith.addf %101, %106 : vector<256x128xf32>
    %c0_96 = arith.constant 0 : index
    %c0_97 = arith.constant 0 : index
    %108 = vector.load %arg10[%c0_96, %c0_97] : memref<256x128xf32, #tpu.memory_space<vmem>>, vector<256x128xf32>
    tpu.vector_store %arg10[%c0_96, %c0_97], %107 {strides = array<i32>} : memref<256x128xf32, #tpu.memory_space<vmem>>, vector<256x128xf32>,
    %c1_98 = arith.constant 1 : index
    %c2_99 = arith.constant 2 : index
    %c0_100 = arith.constant 0 : index
    %109 = vector.load %arg9[%c1_98, %c2_99, %c0_100] : memref<18x18x128xf32, #tpu.memory_space<vmem>>, vector<16x16x128xf32>
    %c0_101 = arith.constant 0 : index
    %c0_102 = arith.constant 0 : index
    %110 = vector.load %arg10[%c0_101, %c0_102] : memref<256x128xf32, #tpu.memory_space<vmem>>, vector<256x128xf32>
    %111 = vector.shape_cast %109 : vector<16x16x128xf32> to vector<256x128xf32>
    %112 = arith.truncf %111 : vector<256x128xf32> to vector<256x128xbf16>
    %c5 = arith.constant 5 : index
    %c0_103 = arith.constant 0 : index
    %c0_104 = arith.constant 0 : index
    %113 = vector.load %arg7[%c5, %c0_103, %c0_104] : memref<9x128x128xbf16, #tpu.memory_space<vmem>>, vector<1x128x128xbf16>
    %114 = vector.shape_cast %113 : vector<1x128x128xbf16> to vector<128x128xbf16>
    %cst_105 = arith.constant dense<0.000000e+00> : vector<256x128xf32>
    %115 = tpu.matmul %112, %114, %cst_105 {dimension_numbers = #tpu.dot_dimension_numbers<[1], [0], [0], [1], [0, 0, 1, 1], [], []>} : vector<256x128xbf16>, vector<128x128xbf16>, vector<256x128xf32> -> vector<256x128xf32>
    %116 = arith.addf %110, %115 : vector<256x128xf32>
    %c0_106 = arith.constant 0 : index
    %c0_107 = arith.constant 0 : index
    %117 = vector.load %arg10[%c0_106, %c0_107] : memref<256x128xf32, #tpu.memory_space<vmem>>, vector<256x128xf32>
    tpu.vector_store %arg10[%c0_106, %c0_107], %116 {strides = array<i32>} : memref<256x128xf32, #tpu.memory_space<vmem>>, vector<256x128xf32>,
    %c2_108 = arith.constant 2 : index
    %c0_109 = arith.constant 0 : index
    %c0_110 = arith.constant 0 : index
    %118 = vector.load %arg9[%c2_108, %c0_109, %c0_110] : memref<18x18x128xf32, #tpu.memory_space<vmem>>, vector<16x16x128xf32>
    %c0_111 = arith.constant 0 : index
    %c0_112 = arith.constant 0 : index
    %119 = vector.load %arg10[%c0_111, %c0_112] : memref<256x128xf32, #tpu.memory_space<vmem>>, vector<256x128xf32>
    %120 = vector.shape_cast %118 : vector<16x16x128xf32> to vector<256x128xf32>
    %121 = arith.truncf %120 : vector<256x128xf32> to vector<256x128xbf16>
    %c6 = arith.constant 6 : index
    %c0_113 = arith.constant 0 : index
    %c0_114 = arith.constant 0 : index
    %122 = vector.load %arg7[%c6, %c0_113, %c0_114] : memref<9x128x128xbf16, #tpu.memory_space<vmem>>, vector<1x128x128xbf16>
    %123 = vector.shape_cast %122 : vector<1x128x128xbf16> to vector<128x128xbf16>
    %cst_115 = arith.constant dense<0.000000e+00> : vector<256x128xf32>
    %124 = tpu.matmul %121, %123, %cst_115 {dimension_numbers = #tpu.dot_dimension_numbers<[1], [0], [0], [1], [0, 0, 1, 1], [], []>} : vector<256x128xbf16>, vector<128x128xbf16>, vector<256x128xf32> -> vector<256x128xf32>
    %125 = arith.addf %119, %124 : vector<256x128xf32>
    %c0_116 = arith.constant 0 : index
    %c0_117 = arith.constant 0 : index
    %126 = vector.load %arg10[%c0_116, %c0_117] : memref<256x128xf32, #tpu.memory_space<vmem>>, vector<256x128xf32>
    tpu.vector_store %arg10[%c0_116, %c0_117], %125 {strides = array<i32>} : memref<256x128xf32, #tpu.memory_space<vmem>>, vector<256x128xf32>,
    %c2_118 = arith.constant 2 : index
    %c1_119 = arith.constant 1 : index
    %c0_120 = arith.constant 0 : index
    %127 = vector.load %arg9[%c2_118, %c1_119, %c0_120] : memref<18x18x128xf32, #tpu.memory_space<vmem>>, vector<16x16x128xf32>
    %c0_121 = arith.constant 0 : index
    %c0_122 = arith.constant 0 : index
    %128 = vector.load %arg10[%c0_121, %c0_122] : memref<256x128xf32, #tpu.memory_space<vmem>>, vector<256x128xf32>
    %129 = vector.shape_cast %127 : vector<16x16x128xf32> to vector<256x128xf32>
    %130 = arith.truncf %129 : vector<256x128xf32> to vector<256x128xbf16>
    %c7 = arith.constant 7 : index
    %c0_123 = arith.constant 0 : index
    %c0_124 = arith.constant 0 : index
    %131 = vector.load %arg7[%c7, %c0_123, %c0_124] : memref<9x128x128xbf16, #tpu.memory_space<vmem>>, vector<1x128x128xbf16>
    %132 = vector.shape_cast %131 : vector<1x128x128xbf16> to vector<128x128xbf16>
    %cst_125 = arith.constant dense<0.000000e+00> : vector<256x128xf32>
    %133 = tpu.matmul %130, %132, %cst_125 {dimension_numbers = #tpu.dot_dimension_numbers<[1], [0], [0], [1], [0, 0, 1, 1], [], []>} : vector<256x128xbf16>, vector<128x128xbf16>, vector<256x128xf32> -> vector<256x128xf32>
    %134 = arith.addf %128, %133 : vector<256x128xf32>
    %c0_126 = arith.constant 0 : index
    %c0_127 = arith.constant 0 : index
    %135 = vector.load %arg10[%c0_126, %c0_127] : memref<256x128xf32, #tpu.memory_space<vmem>>, vector<256x128xf32>
    tpu.vector_store %arg10[%c0_126, %c0_127], %134 {strides = array<i32>} : memref<256x128xf32, #tpu.memory_space<vmem>>, vector<256x128xf32>,
    %c2_128 = arith.constant 2 : index
    %c2_129 = arith.constant 2 : index
    %c0_130 = arith.constant 0 : index
    %136 = vector.load %arg9[%c2_128, %c2_129, %c0_130] : memref<18x18x128xf32, #tpu.memory_space<vmem>>, vector<16x16x128xf32>
    %c0_131 = arith.constant 0 : index
    %c0_132 = arith.constant 0 : index
    %137 = vector.load %arg10[%c0_131, %c0_132] : memref<256x128xf32, #tpu.memory_space<vmem>>, vector<256x128xf32>
    %138 = vector.shape_cast %136 : vector<16x16x128xf32> to vector<256x128xf32>
    %139 = arith.truncf %138 : vector<256x128xf32> to vector<256x128xbf16>
    %c8_133 = arith.constant 8 : index
    %c0_134 = arith.constant 0 : index
    %c0_135 = arith.constant 0 : index
    %140 = vector.load %arg7[%c8_133, %c0_134, %c0_135] : memref<9x128x128xbf16, #tpu.memory_space<vmem>>, vector<1x128x128xbf16>
    %141 = vector.shape_cast %140 : vector<1x128x128xbf16> to vector<128x128xbf16>
    %cst_136 = arith.constant dense<0.000000e+00> : vector<256x128xf32>
    %142 = tpu.matmul %139, %141, %cst_136 {dimension_numbers = #tpu.dot_dimension_numbers<[1], [0], [0], [1], [0, 0, 1, 1], [], []>} : vector<256x128xbf16>, vector<128x128xbf16>, vector<256x128xf32> -> vector<256x128xf32>
    %143 = arith.addf %137, %142 : vector<256x128xf32>
    %c0_137 = arith.constant 0 : index
    %c0_138 = arith.constant 0 : index
    %144 = vector.load %arg10[%c0_137, %c0_138] : memref<256x128xf32, #tpu.memory_space<vmem>>, vector<256x128xf32>
    tpu.vector_store %arg10[%c0_137, %c0_138], %143 {strides = array<i32>} : memref<256x128xf32, #tpu.memory_space<vmem>>, vector<256x128xf32>,
    %c0_139 = arith.constant 0 : index
    %c0_140 = arith.constant 0 : index
    %145 = vector.load %arg10[%c0_139, %c0_140] : memref<256x128xf32, #tpu.memory_space<vmem>>, vector<256x128xf32>
    %146 = vector.shape_cast %145 : vector<256x128xf32> to vector<1x16x16x128xf32>
    %147 = arith.truncf %146 : vector<1x16x16x128xf32> to vector<1x16x16x128xbf16>
    %c0_141 = arith.constant 0 : index
    %c0_142 = arith.constant 0 : index
    %c0_143 = arith.constant 0 : index
    %c0_144 = arith.constant 0 : index
    %148 = vector.load %arg8[%c0_141, %c0_142, %c0_143, %c0_144] : memref<1x16x16x128xbf16, #tpu.memory_space<vmem>>, vector<1x16x16x128xbf16>
    tpu.vector_store %arg8[%c0_141, %c0_142, %c0_143, %c0_144], %147 {strides = array<i32>} : memref<1x16x16x128xbf16, #tpu.memory_space<vmem>>, vector<1x16x16x128xbf16>,
    return
  }
  func.func @transform_0(%arg0: i32) -> (i32, i32, i32, i32) {
    %c0_i32 = arith.constant 0 : i32
    %c0_i32_0 = arith.constant 0 : i32
    %c0_i32_1 = arith.constant 0 : i32
    %c0_i32_2 = arith.constant 0 : i32
    return %arg0, %c0_i32, %c0_i32_0, %c0_i32_1 : i32, i32, i32, i32
  }
  func.func @transform_1(%arg0: i32) -> (i32, i32) {
    %c0_i32 = arith.constant 0 : i32
    %c0_i32_0 = arith.constant 0 : i32
    %c0_i32_1 = arith.constant 0 : i32
    return %c0_i32, %c0_i32_0 : i32, i32
  }
  func.func @transform_2(%arg0: i32) -> (i32, i32) {
    %c0_i32 = arith.constant 0 : i32
    %c0_i32_0 = arith.constant 0 : i32
    %c0_i32_1 = arith.constant 0 : i32
    return %c0_i32, %c0_i32_0 : i32, i32
  }
  func.func @transform_3(%arg0: i32) -> (i32, i32) {
    %c0_i32 = arith.constant 0 : i32
    %c0_i32_0 = arith.constant 0 : i32
    %c0_i32_1 = arith.constant 0 : i32
    return %c0_i32, %c0_i32_0 : i32, i32
  }
  func.func @transform_4(%arg0: i32) -> (i32, i32) {
    %c0_i32 = arith.constant 0 : i32
    %c0_i32_0 = arith.constant 0 : i32
    %c0_i32_1 = arith.constant 0 : i32
    return %c0_i32, %c0_i32_0 : i32, i32
  }
  func.func @transform_5(%arg0: i32) -> (i32, i32) {
    %c0_i32 = arith.constant 0 : i32
    %c0_i32_0 = arith.constant 0 : i32
    %c0_i32_1 = arith.constant 0 : i32
    return %c0_i32, %c0_i32_0 : i32, i32
  }
  func.func @transform_6(%arg0: i32) -> (i32, i32, i32) {
    %c0_i32 = arith.constant 0 : i32
    %c0_i32_0 = arith.constant 0 : i32
    %c0_i32_1 = arith.constant 0 : i32
    %c0_i32_2 = arith.constant 0 : i32
    return %c0_i32, %c0_i32_0, %c0_i32_1 : i32, i32, i32
  }
  func.func @transform_7(%arg0: i32) -> (i32, i32, i32, i32) {
    %c0_i32 = arith.constant 0 : i32
    %c0_i32_0 = arith.constant 0 : i32
    %c0_i32_1 = arith.constant 0 : i32
    %c0_i32_2 = arith.constant 0 : i32
    return %arg0, %c0_i32, %c0_i32_0, %c0_i32_1 : i32, i32, i32, i32
  }
}

</mosaic_0001>

<bundles_post_ra>
// kernel: dense_module_forward.2
= control target key start
LH: loop header
LB: loop body
LE: loop exit
PB: predicated region body
PF: predicated region fallthrough
CT: control target
= control target key end

     0   :  { %s6395_s24 = smov 0   ;;  %s7224_s0 = inlined_call_operand.vmem [shape: bf16[2,16,16,128], index: 0, kind: input, shape index: {}]   ;;  %s7225_s1 = inlined_call_operand.vmem [shape: f32[1,128], index: 1, kind: input, shape index: {}]   ;;  %s7226_s2 = inlined_call_operand.vmem [shape: f32[1,128], index: 2, kind: input, shape index: {}]   ;;  %s7227_s3 = inlined_call_operand.vmem [shape: bf16[128,128], index: 3, kind: input, shape index: {}]   ;;  %s7228_s4 = inlined_call_operand.vmem [shape: f32[1,128], index: 4, kind: input, shape index: {}]   ;;  %s7229_s5 = inlined_call_operand.vmem [shape: f32[1,128], index: 5, kind: input, shape index: {}]   ;;  %s7230_s6 = inlined_call_operand.vmem [shape: bf16[9,128,128], index: 6, kind: input, shape index: {}]   ;;  %s7231_s7 = inlined_call_operand.vmem [shape: bf16[2,16,16,128], index: 7, kind: output, shape index: {}]  }
   0x1 LB: > { %s4756_s25 = sadd.s32 4294967295, %s6352_s24   ;;  %p4760_p0 = scmp.ge.s32.totalorder %s6352_s24, 1  ;;  %s6352_s24 = sphi %s6395_s24, %s17_s24  }
   0x2   : > { %p237_p1 = scmp.lt.s32.totalorder %s6352_s24, 3 }
   0x4   : > { %p238_p2 = pnand %p4760_p0, %p237_p1 }
   0x5   : > { %v6256_v0 = vld [vmem:[%s7227_s3] sm:$0xff] (!%p238_p2)   ;;  %p269_p3 = scmp.lt.s32.totalorder (!%p238_p2), %s4756_s25, 1  ;;  %v6257_v1 = vld [vmem:[%s7227_s3 + $0x8] sm:$0xff] (!%p238_p2)   ;;  %v6354_v2 = vmov (!%p238_p2), 0.0   ;;  %v6258_v3 = vld [vmem:[%s7227_s3 + $0x10] sm:$0xff] (!%p238_p2)  }
   0x6   : > { %241 = sbr.rel (%p238_p2) target bundleno = 796 (0x31c), region = 48  ;;  %5495 = vmatprep.subr.bf16.mxu1 (!%p238_p2), %v6256_v0  ;;  %286 = vst [vmem:[#allocation2 + $0x30] sm:$0xff] (!%p238_p2), %v6354_v2  ;;  %287 = vst [vmem:[#allocation2 + $0x38] sm:$0xff] (!%p238_p2), %v6354_v2  ;;  %v6259_v4 = vld [vmem:[%s7227_s3 + $0x18] sm:$0xff] (!%p238_p2)   ;;  %v6429_v6 = vld [vmem:[%s7225_s1] ss:$0 sm:$0xff] (!%p238_p2) }
   0x7   : > { %280 = vst [vmem:[#allocation2] sm:$0xff] (!%p238_p2), %v6354_v2  ;;  %281 = vst [vmem:[#allocation2 + $0x8] sm:$0xff] (!%p238_p2), %v6354_v2  ;;  %5496 = vmatpush3.bf16.msra.mxu1 (!%p238_p2), %v6256_v0  ;;  %v6435_v10 = vld [vmem:[%s7226_s2] ss:$0 sm:$0xff] (!%p238_p2)  ;;  %v6261_v31 = vld [vmem:[%s7227_s3 + $0x28] sm:$0xff] (!%p238_p2)  }
   0x8   : > { %282 = vst [vmem:[#allocation2 + $0x10] sm:$0x3] (!%p238_p2), %v6354_v2  ;;  %283 = vst [vmem:[#allocation2 + $0x18] sm:$0xff] (!%p238_p2), %v6354_v2  ;;  %5497 = vmatprep.subr.bf16.mxu1 (!%p238_p2), %v6257_v1  ;;  %v6260_v17 = vld [vmem:[%s7227_s3 + $0x20] sm:$0xff] (!%p238_p2)   ;;  %v6262_v40 = vld [vmem:[%s7227_s3 + $0x30] sm:$0xff] (!%p238_p2)  }
   0x9   : > { %284 = vst [vmem:[#allocation2 + $0x20] sm:$0xff] (!%p238_p2), %v6354_v2  ;;  %285 = vst [vmem:[#allocation2 + $0x28] sm:$0x3] (!%p238_p2), %v6354_v2  ;;  %v6263_v55 = vld [vmem:[%s7227_s3 + $0x38] sm:$0xff] (!%p238_p2)  }
   0xa   : > { %288 = vst [vmem:[#allocation2 + $0x40] sm:$0x3] (!%p238_p2), %v6354_v2  ;;  %289 = vst [vmem:[#allocation2 + $0x48] sm:$0xff] (!%p238_p2), %v6354_v2 }
   0xb   : > { %290 = vst [vmem:[#allocation2 + $0x50] sm:$0xff] (!%p238_p2), %v6354_v2  ;;  %291 = vst [vmem:[#allocation2 + $0x58] sm:$0x3] (!%p238_p2), %v6354_v2  ;;  %5498 = vmatpush3.bf16.msra.mxu1 (!%p238_p2), %v6257_v1 }
   0xc   : > { %292 = vst [vmem:[#allocation2 + $0x60] sm:$0xff] (!%p238_p2), %v6354_v2  ;;  %293 = vst [vmem:[#allocation2 + $0x68] sm:$0xff] (!%p238_p2), %v6354_v2  ;;  %5499 = vmatprep.subr.bf16.mxu1 (!%p238_p2), %v6258_v3 }
   0xd   : > { %s7233_s25 = smov (!%p269_p3, %s4756_s25), 1  ;;  %294 = vst [vmem:[#allocation2 + $0x70] sm:$0x3] %v6354_v2  ;;  %295 = vst [vmem:[#allocation2 + $0x78] sm:$0xff] %v6354_v2 }
   0xe   : > { %296 = vst [vmem:[#allocation2 + $0x80] sm:$0xff] %v6354_v2  ;;  %297 = vst [vmem:[#allocation2 + $0x88] sm:$0x3] %v6354_v2  ;;  %s5039_s9 = sshll.u32 %s7233_s25, 7 }
   0xf   : > { %298 = vst [vmem:[#allocation2 + $0x90] sm:$0xff] %v6354_v2  ;;  %299 = vst [vmem:[#allocation2 + $0x98] sm:$0xff] %v6354_v2  ;;  %s6420_s12 = scalar_lea.vmem %s7224_s0, %s5039_s9  ;;  %5500 = vmatpush3.bf16.msra.mxu1 %v6258_v3  ;;  %v6273_v3 = vld [vmem:[%s7230_s6 + $0x100] sm:$0xff]   ;;  %s7187_s14 = scalar_lea.vmem %s7231_s7, %s5039_s9 }
  0x10   : > { %300 = vst [vmem:[#allocation2 + $0xa0] sm:$0x3] %v6354_v2  ;;  %301 = vst [vmem:[#allocation2 + $0xa8] sm:$0xff] %v6354_v2  ;;  %v5074_v5 = vld [vmem:[%s6420_s12] sm:$0xff]   ;;  %v5217_v9 = vld [vmem:[%s6420_s12 + $0x8] sm:$0xff]   ;;  %5501 = vmatprep.subr.bf16.mxu1 %v6259_v4  ;;  %5751 = vmatprep.subr.bf16.mxu0 %v6273_v3 }
  0x11   : > { %302 = vst [vmem:[#allocation2 + $0xb0] sm:$0xff] %v6354_v2  ;;  %303 = vst [vmem:[#allocation2 + $0xb8] sm:$0x3] %v6354_v2  ;;  %v5075_v7 = vunpack.c.l.bf16 %v5074_v5  ;;  %v5076_v8 = vunpack.c.h.bf16 %v5074_v5  ;;  %v5079_v11 = vunpack.c.l.bf16 %v5217_v9  ;;  %v5080_v12 = vunpack.c.h.bf16 %v5217_v9  ;;  %v5218_v15 = vld [vmem:[%s6420_s12 + $0x10] sm:$0xff]   ;;  %v5219_v16 = vld [vmem:[%s6420_s12 + $0x18] sm:$0xff]   ;;  %5752 = vmatpush3.bf16.msra.mxu0 %v6273_v3 }
  0x12   : > { %304 = vst [vmem:[#allocation2 + $0xc0] sm:$0xff] %v6354_v2  ;;  %305 = vst [vmem:[#allocation2 + $0xc8] sm:$0xff] %v6354_v2  ;;  %v5083_v20 = vunpack.c.l.bf16 %v5218_v15  ;;  %v5084_v21 = vunpack.c.h.bf16 %v5218_v15  ;;  %v5087_v24 = vunpack.c.l.bf16 %v5219_v16  ;;  %v5088_v32 = vunpack.c.h.bf16 %v5219_v16  ;;  %v5220_v35 = vld [vmem:[%s6420_s12 + $0x20] sm:$0xff]   ;;  %v5221_v39 = vld [vmem:[%s6420_s12 + $0x28] sm:$0xff]  }
  0x13   : > { %306 = vst [vmem:[#allocation2 + $0xd0] sm:$0x3] %v6354_v2  ;;  %307 = vst [vmem:[#allocation2 + $0xd8] sm:$0xff] %v6354_v2  ;;  %v373_v13 = vmul.f32 %v5075_v7, %v6429_v6  ;;  %v374_v14 = vmul.f32 %v5076_v8, %v6429_v6  ;;  %v375_v18 = vmul.f32 %v5079_v11, %v6429_v6  ;;  %5502 = vmatpush3.bf16.msra.mxu1 %v6259_v4  ;;  %v5222_v51 = vld [vmem:[%s6420_s12 + $0x30] sm:$0xff]   ;;  %v5223_v59 = vld [vmem:[%s6420_s12 + $0x38] sm:$0xff]  }
  0x14   : > { %308 = vst [vmem:[#allocation2 + $0xe0] sm:$0xff] %v6354_v2  ;;  %309 = vst [vmem:[#allocation2 + $0xe8] sm:$0x3] %v6354_v2  ;;  %v376_v19 = vmul.f32 %v5080_v12, %v6429_v6  ;;  %v377_v27 = vmul.f32 %v5083_v20, %v6429_v6  ;;  %v378_v28 = vmul.f32 %v5084_v21, %v6429_v6  ;;  %5503 = vmatprep.subr.bf16.mxu1 %v6260_v17  ;;  %v6264_v8 = vld [vmem:[%s7227_s3] sm:$0xff]  }
  0x15   : > { %310 = vst [vmem:[#allocation2 + $0xf0] sm:$0xff] %v6354_v2  ;;  %311 = vst [vmem:[#allocation2 + $0xf8] sm:$0xff] %v6354_v2  ;;  %v396_v22 = vadd.f32 %v6435_v10, %v373_v13  ;;  %v397_v23 = vadd.f32 %v6435_v10, %v374_v14  ;;  %v398_v25 = vadd.f32 %v6435_v10, %v375_v18  ;;  %v5091_v44 = vunpack.c.l.bf16 %v5220_v35  ;;  %v5224_v13 = vld [vmem:[%s6420_s12 + $0x40] sm:$0xff]  }
  0x16   : > { %312 = vst [vmem:[#allocation2 + $0x100] sm:$0x3] %v6354_v2  ;;  %313 = vst [vmem:[#allocation2 + $0x108] sm:$0xff] %v6354_v2  ;;  %v399_v26 = vadd.f32 %v6435_v10, %v376_v19  ;;  %v400_v37 = vadd.f32 %v6435_v10, %v377_v27  ;;  %v401_v38 = vadd.f32 %v6435_v10, %v378_v28  ;;  %v5092_v46 = vunpack.c.h.bf16 %v5220_v35  ;;  %v6265_v19 = vld [vmem:[%s7227_s3 + $0x8] sm:$0xff]  }
  0x17   : > { %314 = vst [vmem:[#allocation2 + $0x110] sm:$0xff] %v6354_v2  ;;  %315 = vst [vmem:[#allocation2 + $0x118] sm:$0x3] %v6354_v2  ;;  %vm412_vm0 = vcmp.ge.f32.partialorder %v396_v22, 0.0  ;;  %vm413_vm1 = vcmp.ge.f32.partialorder %v397_v23, 0.0  ;;  %5504 = vmatpush3.bf16.msra.mxu1 %v6260_v17  ;;  %vm414_vm2 = vcmp.ge.f32.partialorder %v398_v25, 0.0  ;;  %v379_v41 = vmul.f32 %v5087_v24, %v6429_v6 }
  0x18   : > { %316 = vst [vmem:[#allocation2 + $0x120] sm:$0xff] %v6354_v2  ;;  %317 = vst [vmem:[#allocation2 + $0x128] sm:$0xff] %v6354_v2  ;;  %v428_v29 = vmul.f32 0.01, %v396_v22  ;;  %v429_v30 = vmul.f32 0.01, %v397_v23  ;;  %5505 = vmatprep.subr.bf16.mxu1 %v6261_v31  ;;  %v380_v43 = vmul.f32 %v5088_v32, %v6429_v6  ;;  %v5095_v47 = vunpack.c.l.bf16 %v5221_v39 }
  0x19   : > { %318 = vst [vmem:[#allocation2 + $0x130] sm:$0x3] %v6354_v2  ;;  %319 = vst [vmem:[#allocation2 + $0x138] sm:$0xff] %v6354_v2  ;;  %vm415_vm3 = vcmp.ge.f32.partialorder %v399_v26, 0.0  ;;  %v430_v42 = vmul.f32 0.01, %v398_v25  ;;  %v5096_v48 = vunpack.c.h.bf16 %v5221_v39  ;;  %v402_v52 = vadd.f32 %v6435_v10, %v379_v41 }
  0x1a   : > { %320 = vst [vmem:[#allocation2 + $0x140] sm:$0xff] %v6354_v2  ;;  %321 = vst [vmem:[#allocation2 + $0x148] sm:$0x3] %v6354_v2  ;;  %v444_v33 = vsel %vm412_vm0, %v396_v22, %v428_v29  ;;  %v445_v34 = vsel %vm413_vm1, %v397_v23, %v429_v30  ;;  %v431_v45 = vmul.f32 0.01, %v399_v26  ;;  %vm416_vm4 = vcmp.ge.f32.partialorder %v400_v37, 0.0 }
  0x1b   : > { %322 = vst [vmem:[#allocation2 + $0x150] sm:$0xff] %v6354_v2  ;;  %323 = vst [vmem:[#allocation2 + $0x158] sm:$0xff] %v6354_v2  ;;  %v460_v36 = vpack.c.bf16 %v445_v34, %v444_v33  ;;  %v432_v49 = vmul.f32 0.01, %v400_v37  ;;  %v433_v50 = vmul.f32 0.01, %v401_v38  ;;  %5506 = vmatpush3.bf16.msra.mxu1 %v6261_v31  ;;  %v381_v53 = vmul.f32 %v5091_v44, %v6429_v6 }
  0x1c   : > { %324 = vst [vmem:[#allocation2 + $0x160] sm:$0x3] %v6354_v2  ;;  %325 = vst [vmem:[#allocation2 + $0x168] sm:$0xff] %v6354_v2  ;;  %vm417_vm5 = vcmp.ge.f32.partialorder %v401_v38, 0.0  ;;  %v382_v54 = vmul.f32 %v5092_v46, %v6429_v6  ;;  %5507 = vmatprep.subr.bf16.mxu1 %v6262_v40  ;;  %v403_v56 = vadd.f32 %v6435_v10, %v380_v43  ;;  %v5099_v62 = vunpack.c.l.bf16 %v5222_v51  ;;  %v6275_v17 = vld [vmem:[%s7230_s6 + $0x108] sm:$0xff]   ;;  %v6277_v29 = vld [vmem:[%s7230_s6 + $0x110] sm:$0xff]  }
  0x1d   : > { %326 = vst [vmem:[#allocation2 + $0x170] sm:$0xff] %v6354_v2  ;;  %327 = vst [vmem:[#allocation2 + $0x178] sm:$0x3] %v6354_v2  ;;  %5511 = vmatprep.mubr.bf16.mxu1 %v460_v36  ;;  %v383_v57 = vmul.f32 %v5095_v47, %v6429_v6  ;;  %v384_v58 = vmul.f32 %v5096_v48, %v6429_v6  ;;  %v446_v60 = vsel %vm414_vm2, %v398_v25, %v430_v42  ;;  %v5225_v32 = vld [vmem:[%s6420_s12 + $0x48] sm:$0xff]   ;;  %v5226_v33 = vld [vmem:[%s6420_s12 + $0x50] sm:$0xff]  }
  0x1e   : > { %328 = vst [vmem:[#allocation2 + $0x180] sm:$0xff] %v6354_v2  ;;  %329 = vst [vmem:[#allocation2 + $0x188] sm:$0xff] %v6354_v2  ;;  %v404_v61 = vadd.f32 %v6435_v10, %v381_v53  ;;  %v447_v63 = vsel %vm415_vm3, %v399_v26, %v431_v45  ;;  %v448_v0 = vsel %vm416_vm4, %v400_v37, %v432_v49  ;;  %vm418_vm6 = vcmp.ge.f32.partialorder %v402_v52, 0.0  ;;  %v6266_v34 = vld [vmem:[%s7227_s3 + $0x10] sm:$0xff]   ;;  %v5227_v44 = vld [vmem:[%s6420_s12 + $0x58] sm:$0xff]  }
  0x1f   : > { %330 = vst [vmem:[#allocation2 + $0x190] sm:$0x3] %v6354_v2  ;;  %331 = vst [vmem:[#allocation2 + $0x198] sm:$0xff] %v6354_v2  ;;  %v449_v1 = vsel %vm417_vm5, %v401_v38, %v433_v50  ;;  %5508 = vmatpush3.bf16.msra.mxu1 %v6262_v40  ;;  %v434_v4 = vmul.f32 0.01, %v402_v52  ;;  %v405_v5 = vadd.f32 %v6435_v10, %v382_v54  ;;  %v5103_v7 = vunpack.c.l.bf16 %v5223_v59 }
  0x20   : > { %332 = vst [vmem:[#allocation2 + $0x1a0] sm:$0xff] %v6354_v2  ;;  %333 = vst [vmem:[#allocation2 + $0x1a8] sm:$0x3] %v6354_v2  ;;  %v5100_v2 = vunpack.c.h.bf16 %v5222_v51  ;;  %5509 = vmatprep.subr.bf16.mxu1 %v6263_v55  ;;  %vm419_vm7 = vcmp.ge.f32.partialorder %v403_v56, 0.0  ;;  %v435_v9 = vmul.f32 0.01, %v403_v56  ;;  %v6487_v11 = vadd.f32 %v6435_v10, %v383_v57  ;;  %5753 = vmatprep.subr.bf16.mxu0 %v6275_v17 }
  0x21   : > { %v6490_v12 = vadd.f32 %v6435_v10, %v384_v58  ;;  %vm420_vm8 = vcmp.ge.f32.partialorder %v404_v61, 0.0  ;;  %v436_v14 = vmul.f32 0.01, %v404_v61  ;;  %v385_v15 = vmul.f32 %v5099_v62, %v6429_v6  ;;  %5754 = vmatpush3.bf16.msra.mxu0 %v6275_v17  ;;  %v6267_v51 = vld [vmem:[%s7227_s3 + $0x18] sm:$0xff]   ;;  %v5228_v62 = vld [vmem:[%s6420_s12 + $0x60] sm:$0xff]  }
  0x22   : > { %v386_v16 = vmul.f32 %v5100_v2, %v6429_v6  ;;  %v461_v18 = vpack.c.bf16 %v447_v63, %v446_v60  ;;  %v462_v20 = vpack.c.bf16 %v449_v1, %v448_v0  ;;  %v5104_v21 = vunpack.c.h.bf16 %v5223_v59  ;;  %5755 = vmatprep.subr.bf16.mxu0 %v6277_v29 }
  0x23   : > { %5510 = vmatpush3.bf16.msra.mxu1 %v6263_v55  ;;  %v437_v22 = vmul.f32 0.01, %v405_v5  ;;  %v408_v23 = vadd.f32 %v6435_v10, %v385_v15  ;;  %v387_v25 = vmul.f32 %v5103_v7, %v6429_v6  ;;  %v450_v26 = vsel %vm418_vm6, %v402_v52, %v434_v4  ;;  %v5230_v15 = vld [vmem:[%s6420_s12 + $0x70] sm:$0xff]  }
  0x24   : > { %v409_v24 = vadd.f32 %v6435_v10, %v386_v16  ;;  %5527 = vmatprep.subr.bf16.mxu1 %v6264_v8  ;;  %v451_v27 = vsel %vm419_vm7, %v403_v56, %v435_v9  ;;  %vm421_vm9 = vcmp.ge.f32.partialorder %v405_v5, 0.0  ;;  %v5107_v28 = vunpack.c.l.bf16 %v5224_v13 }
  0x25   : > { %vm422_vm10 = vcmp.ge.f32.partialorder %v6487_v11, 0.0  ;;  %vm423_vm11 = vcmp.ge.f32.partialorder %v6490_v12, 0.0  ;;  %v438_v30 = vmul.f32 0.01, %v6487_v11  ;;  %v388_v31 = vmul.f32 %v5104_v21, %v6429_v6  ;;  %5756 = vmatpush3.bf16.msra.mxu0 %v6277_v29 }
  0x26   : > { %5512 = vmatmul.mubr.bf16.vlgmr.msra.gmra.mrb[0].mxu1 %v461_v18  ;;  %v439_v35 = vmul.f32 0.01, %v6490_v12  ;;  %vm424_vm12 = vcmp.ge.f32.partialorder %v408_v23, 0.0  ;;  %vm425_vm13 = vcmp.ge.f32.partialorder %v409_v24, 0.0  ;;  %v5108_v36 = vunpack.c.h.bf16 %v5224_v13 }
  0x27   : > { %5528 = vmatpush3.bf16.msra.mxu1 %v6264_v8  ;;  %5515 = vmatprep.mubr.bf16.mxu1 %v462_v20  ;;  %v452_v37 = vsel %vm420_vm8, %v404_v61, %v436_v14  ;;  %v410_v38 = vadd.f32 %v6435_v10, %v387_v25  ;;  %v780_v39 = vmul.f32 %v5107_v28, %v6429_v6  ;;  %v440_v41 = vmul.f32 0.01, %v408_v23  ;;  %v5229_v14 = vld [vmem:[%s6420_s12 + $0x68] sm:$0xff]  }
  0x28   : > { %5529 = vmatprep.subr.bf16.mxu1 %v6265_v19  ;;  %v453_v40 = vsel %vm421_vm9, %v405_v5, %v437_v22  ;;  %v441_v42 = vmul.f32 0.01, %v409_v24  ;;  %v5111_v43 = vunpack.c.l.bf16 %v5225_v32  ;;  %v411_v45 = vadd.f32 %v6435_v10, %v388_v31  ;;  %v6268_v5 = vld [vmem:[%s7227_s3 + $0x20] sm:$0xff]  }
  0x29   : > { %v781_v46 = vmul.f32 %v5108_v36, %v6429_v6  ;;  %v463_v47 = vpack.c.bf16 %v451_v27, %v450_v26  ;;  %v803_v48 = vadd.f32 %v6435_v10, %v780_v39  ;;  %v5112_v49 = vunpack.c.h.bf16 %v5225_v32  ;;  %v6270_v32 = vld [vmem:[%s7227_s3 + $0x30] sm:$0xff]  }
  0x2a   : > { %v5115_v50 = vunpack.c.l.bf16 %v5226_v33  ;;  %v464_v52 = vpack.c.bf16 %v453_v40, %v452_v37  ;;  %vm426_vm14 = vcmp.ge.f32.partialorder %v410_v38, 0.0  ;;  %v442_v53 = vmul.f32 0.01, %v410_v38 }
  0x2b   : > { %5530 = vmatpush3.bf16.msra.mxu1 %v6265_v19  ;;  %v5116_v54 = vunpack.c.h.bf16 %v5226_v33  ;;  %v454_v55 = vsel %vm422_vm10, %v6487_v11, %v438_v30  ;;  %v455_v56 = vsel %vm423_vm11, %v6490_v12, %v439_v35  ;;  %v804_v57 = vadd.f32 %v6435_v10, %v781_v46 }
  0x2c   : > { %5531 = vmatprep.subr.bf16.mxu1 %v6266_v34  ;;  %v782_v58 = vmul.f32 %v5111_v43, %v6429_v6  ;;  %v456_v59 = vsel %vm424_vm12, %v408_v23, %v440_v41  ;;  %v457_v60 = vsel %vm425_vm13, %v409_v24, %v441_v42  ;;  %vm427_vm15 = vcmp.ge.f32.partialorder %v411_v45, 0.0  ;;  %v6269_v24 = vld [vmem:[%s7227_s3 + $0x28] sm:$0xff]  }
  0x2d   : > { %v5119_v61 = vunpack.c.l.bf16 %v5227_v44  ;;  %v443_v63 = vmul.f32 0.01, %v411_v45  ;;  %v835_v0 = vmul.f32 0.01, %v803_v48  ;;  %v783_v1 = vmul.f32 %v5112_v49, %v6429_v6 }
  0x2e   : > { %5516 = vmatmul.mubr.bf16.gmra.mrb[4].mxu1 %v463_v47  ;;  %v784_v2 = vmul.f32 %v5115_v50, %v6429_v6  ;;  %v785_v3 = vmul.f32 %v5116_v54, %v6429_v6  ;;  %v5120_v4 = vunpack.c.h.bf16 %v5227_v44  ;;  %vm819_vm0 = vcmp.ge.f32.partialorder %v803_v48, 0.0  ;;  %v6271_v47 = vld [vmem:[%s7227_s3 + $0x38] sm:$0xff]  }
  0x2f   : > { %5532 = vmatpush3.bf16.msra.mxu1 %v6266_v34  ;;  %5519 = vmatprep.mubr.bf16.mxu1 %v464_v52  ;;  %v836_v7 = vmul.f32 0.01, %v804_v57  ;;  %v6548_v8 = vadd.f32 %v6435_v10, %v782_v58  ;;  %v5123_v9 = vunpack.c.l.bf16 %v5228_v62  ;;  %v465_v11 = vpack.c.bf16 %v455_v56, %v454_v55 }
  0x30   : > { %5533 = vmatprep.subr.bf16.mxu1 %v6267_v51  ;;  %v466_v12 = vpack.c.bf16 %v457_v60, %v456_v59  ;;  %vm820_vm1 = vcmp.ge.f32.partialorder %v804_v57, 0.0  ;;  %v786_v13 = vmul.f32 %v5119_v61, %v6429_v6  ;;  %v458_v16 = vsel %vm426_vm14, %v410_v38, %v442_v53  ;;  %v5231_v38 = vld [vmem:[%s6420_s12 + $0x78] sm:$0xff]  }
  0x31   : > { %v6555_v17 = vadd.f32 %v6435_v10, %v783_v1  ;;  %v6558_v18 = vadd.f32 %v6435_v10, %v784_v2  ;;  %v5124_v19 = vunpack.c.h.bf16 %v5228_v62  ;;  %v459_v20 = vsel %vm427_vm15, %v411_v45, %v443_v63  ;;  %v6272_v63 = vld [vmem:[%s7230_s6] sm:$0xff]  }
  0x32   : > { %v851_v21 = vsel %vm819_vm0, %v803_v48, %v835_v0  ;;  %v6563_v22 = vadd.f32 %v6435_v10, %v785_v3  ;;  %v787_v23 = vmul.f32 %v5120_v4, %v6429_v6  ;;  %v852_v25 = vsel %vm820_vm1, %v804_v57, %v836_v7 }
  0x33   : > { %5534 = vmatpush3.bf16.msra.mxu1 %v6267_v51  ;;  %vm821_vm2 = vcmp.ge.f32.partialorder %v6548_v8, 0.0  ;;  %v837_v26 = vmul.f32 0.01, %v6548_v8  ;;  %v788_v27 = vmul.f32 %v5123_v9, %v6429_v6  ;;  %v6573_v28 = vadd.f32 %v6435_v10, %v786_v13 }
  0x34   : > { %5535 = vmatprep.subr.bf16.mxu1 %v6268_v5  ;;  %v789_v29 = vmul.f32 %v5124_v19, %v6429_v6  ;;  %v5127_v30 = vunpack.c.l.bf16 %v5229_v14  ;;  %v5128_v31 = vunpack.c.h.bf16 %v5229_v14  ;;  %vm822_vm3 = vcmp.ge.f32.partialorder %v6555_v17, 0.0 }
  0x35   : > { %v838_v33 = vmul.f32 0.01, %v6555_v17  ;;  %vm823_vm4 = vcmp.ge.f32.partialorder %v6558_v18, 0.0  ;;  %v5131_v34 = vunpack.c.l.bf16 %v5230_v15  ;;  %vm824_vm5 = vcmp.ge.f32.partialorder %v6563_v22, 0.0 }
  0x36   : > { %5520 = vmatmul.mubr.bf16.gmra.mrb[8].mxu1 %v465_v11  ;;  %v839_v35 = vmul.f32 0.01, %v6558_v18  ;;  %v6585_v36 = vadd.f32 %v6435_v10, %v787_v23  ;;  %v790_v37 = vmul.f32 %v5127_v30, %v6429_v6  ;;  %v6590_v39 = vadd.f32 %v6435_v10, %v788_v27  ;;  %v6274_v11 = vld [vmem:[%s7230_s6 + $0x8] sm:$0xff]   ;;  %v6281_v30 = vld [vmem:[%s7230_s6 + $0x120] sm:$0xff]  }
  0x37   : > { %5536 = vmatpush3.bf16.msra.mxu1 %v6268_v5  ;;  %5523 = vmatprep.mubr.bf16.mxu1 %v466_v12  ;;  %v791_v40 = vmul.f32 %v5128_v31, %v6429_v6  ;;  %v5132_v41 = vunpack.c.h.bf16 %v5230_v15  ;;  %v792_v42 = vmul.f32 %v5131_v34, %v6429_v6  ;;  %v840_v43 = vmul.f32 0.01, %v6563_v22  ;;  %v6278_v31 = vld [vmem:[%s7230_s6 + $0x18] sm:$0xff]   ;;  %v6285_v34 = vld [vmem:[%s7230_s6 + $0x130] sm:$0xff]  }
  0x38   : > { %5537 = vmatprep.subr.bf16.mxu1 %v6269_v24  ;;  %v841_v44 = vmul.f32 0.01, %v6573_v28  ;;  %v812_v45 = vadd.f32 %v6435_v10, %v789_v29  ;;  %v467_v46 = vpack.c.bf16 %v459_v20, %v458_v16  ;;  %v6601_v48 = vadd.f32 %v6435_v10, %v790_v37  ;;  %v6276_v16 = vld [vmem:[%s7230_s6 + $0x10] sm:$0xff]   ;;  %v6279_v29 = vld [vmem:[%s7230_s6 + $0x118] sm:$0xff]  }
  0x39   : > { %v6604_v49 = vadd.f32 %v6435_v10, %v791_v40  ;;  %v793_v50 = vmul.f32 %v5132_v41, %v6429_v6  ;;  %v867_v51 = vpack.c.bf16 %v852_v25, %v851_v21  ;;  %v6608_v52 = vadd.f32 %v6435_v10, %v792_v42  ;;  %5757 = vmatprep.subr.bf16.mxu0 %v6279_v29  ;;  %v6284_v37 = vld [vmem:[%s7230_s6 + $0x30] sm:$0xff]   ;;  %v6288_v41 = vld [vmem:[%s7230_s6 + $0x140] sm:$0xff]  }
  0x3a   : > { %v5135_v53 = vunpack.c.l.bf16 %v5231_v38  ;;  %v5136_v54 = vunpack.c.h.bf16 %v5231_v38  ;;  %vm825_vm6 = vcmp.ge.f32.partialorder %v6573_v28, 0.0  ;;  %vm826_vm7 = vcmp.ge.f32.partialorder %v6585_v36, 0.0  ;;  %5758 = vmatpush3.bf16.msra.mxu0 %v6279_v29  ;;  %v6286_v38 = vld [vmem:[%s7230_s6 + $0x38] sm:$0xff]   ;;  %v6703_v42 = vld [vmem:[%s7230_s6 + $0x40] sm:$0xff]  }
  0x3b   : > { %5538 = vmatpush3.bf16.msra.mxu1 %v6269_v24  ;;  %v842_v55 = vmul.f32 0.01, %v6585_v36  ;;  %v843_v56 = vmul.f32 0.01, %v6590_v39  ;;  %vm827_vm8 = vcmp.ge.f32.partialorder %v6590_v39, 0.0  ;;  %vm828_vm9 = vcmp.ge.f32.partialorder %v812_v45, 0.0  ;;  %5759 = vmatprep.subr.bf16.mxu0 %v6281_v30 }
  0x3c   : > { %5539 = vmatprep.subr.bf16.mxu1 %v6270_v32  ;;  %v844_v57 = vmul.f32 0.01, %v812_v45  ;;  %v845_v58 = vmul.f32 0.01, %v6601_v48  ;;  %v846_v59 = vmul.f32 0.01, %v6604_v49  ;;  %v816_v60 = vadd.f32 %v6435_v10, %v793_v50 }
  0x3d   : > { %v794_v61 = vmul.f32 %v5135_v53, %v6429_v6  ;;  %v795_v62 = vmul.f32 %v5136_v54, %v6429_v6  ;;  %v853_v0 = vsel %vm821_vm2, %v6548_v8, %v837_v26  ;;  %v854_v1 = vsel %vm822_vm3, %v6555_v17, %v838_v33  ;;  %v6280_v33 = vld [vmem:[%s7230_s6 + $0x20] sm:$0xff]  }
  0x3e   : > { %5524 = vmatmul.mubr.bf16.gmra.mrb[12].mxu1 %v467_v46  ;;  %v847_v2 = vmul.f32 0.01, %v6608_v52  ;;  %v848_v3 = vmul.f32 0.01, %v816_v60  ;;  %v855_v6 = vsel %vm823_vm4, %v6558_v18, %v839_v35  ;;  %v856_v4 = vsel %vm824_vm5, %v6563_v22, %v840_v43  ;;  %5760 = vmatpush3.bf16.msra.mxu0 %v6281_v30  ;;  %v6282_v35 = vld [vmem:[%s7230_s6 + $0x28] sm:$0xff]  }
  0x3f   : > { %5540 = vmatpush3.bf16.msra.mxu1 %v6270_v32  ;;  %5543 = vmatprep.mubr.bf16.mxu1 %v867_v51  ;;  %v817_v5 = vadd.f32 %v6435_v10, %v794_v61  ;;  %v818_v7 = vadd.f32 %v6435_v10, %v795_v62  ;;  %v868_v8 = vpack.c.bf16 %v854_v1, %v853_v0  ;;  %vm829_vm12 = vcmp.ge.f32.partialorder %v6601_v48, 0.0  ;;  %v6283_v32 = vld [vmem:[%s7230_s6 + $0x128] sm:$0xff]   ;;  %v6709_v43 = vld [vmem:[%s7228_s4] ss:$0 sm:$0xff] }
  0x40   : > { %5541 = vmatprep.subr.bf16.mxu1 %v6271_v47  ;;  %v869_v12 = vpack.c.bf16 %v856_v4, %v855_v6  ;;  %vm830_vm13 = vcmp.ge.f32.partialorder %v6604_v49, 0.0  ;;  %vm831_vm14 = vcmp.ge.f32.partialorder %v6608_v52, 0.0  ;;  %vm832_vm15 = vcmp.ge.f32.partialorder %v816_v60, 0.0  ;;  %5761 = vmatprep.subr.bf16.mxu0 %v6283_v32 }
  0x41   : > { %vm833_vm10 = vcmp.ge.f32.partialorder %v817_v5, 0.0  ;;  %vm834_vm11 = vcmp.ge.f32.partialorder %v818_v7, 0.0  ;;  %v849_v9 = vmul.f32 0.01, %v817_v5  ;;  %v850_v13 = vmul.f32 0.01, %v818_v7 }
  0x42   : > { %v857_v17 = vsel %vm825_vm6, %v6573_v28, %v841_v44  ;;  %v858_v18 = vsel %vm826_vm7, %v6585_v36, %v842_v55  ;;  %v859_v19 = vsel %vm827_vm8, %v6590_v39, %v843_v56  ;;  %v860_v20 = vsel %vm828_vm9, %v812_v45, %v844_v57  ;;  %5762 = vmatpush3.bf16.msra.mxu0 %v6283_v32  ;;  %v6287_v36 = vld [vmem:[%s7230_s6 + $0x138] sm:$0xff]   ;;  %v6344_v39 = vld [vmem:[#allocation2 + $0x30] sm:$0xff]  ;;  %v6714_v45 = vld [vmem:[%s7229_s5] ss:$0 sm:$0xff] }
  0x43   : > { %5542 = vmatpush3.bf16.msra.mxu1 %v6271_v47  ;;  %v865_v14 = vsel %vm833_vm10, %v817_v5, %v849_v9  ;;  %v866_v10 = vsel %vm834_vm11, %v818_v7, %v850_v13  ;;  %v870_v21 = vpack.c.bf16 %v858_v18, %v857_v17  ;;  %v871_v22 = vpack.c.bf16 %v860_v20, %v859_v19 }
  0x44   : > { %5559 = vmatprep.subr.bf16.mxu1 %v6272_v63  ;;  %v874_v15 = vpack.c.bf16 %v866_v10, %v865_v14  ;;  %v861_v23 = vsel %vm829_vm12, %v6601_v48, %v845_v58  ;;  %v862_v24 = vsel %vm830_vm13, %v6604_v49, %v846_v59  ;;  %v863_v25 = vsel %vm831_vm14, %v6608_v52, %v847_v2  ;;  %v6289_v14 = vld [vmem:[%s7230_s6 + $0x148] sm:$0xff]  }
  0x45   : > { %v864_v26 = vsel %vm832_vm15, %v816_v60, %v848_v3  ;;  %v872_v27 = vpack.c.bf16 %v862_v24, %v861_v23  ;;  %5763 = vmatprep.subr.bf16.mxu0 %v6285_v34  ;;  %v1243_v40 = vpack.c.bf16 %v6344_v39, %v6344_v39  ;;  %v6290_v23 = vld [vmem:[%s7230_s6 + $0x150] sm:$0xff]  }
  0x46   : > { %5544 = vmatmul.mubr.bf16.vlgmr.msra.gmra.mrb[16].mxu1 %v868_v8  ;;  %v873_v28 = vpack.c.bf16 %v864_v26, %v863_v25  ;;  %5764 = vmatpush3.bf16.msra.mxu0 %v6285_v34 }
  0x47   : > { %5547 = vmatprep.mubr.bf16.mxu1 %v869_v12  ;;  %5560 = vmatpush3.bf16.msra.mxu1 %v6272_v63 }
  0x48   : > { %5561 = vmatprep.subr.bf16.mxu1 %v6274_v11  ;;  %5765 = vmatprep.subr.bf16.mxu0 %v6287_v36 }
  0x4a   : > { %5766 = vmatpush3.bf16.msra.mxu0 %v6287_v36 }
  0x4b   : > { %5562 = vmatpush3.bf16.msra.mxu1 %v6274_v11  ;;  %5799 = vmatprep.subr.bf16.mxu0 %v6288_v41 }
  0x4c   : > { %5563 = vmatprep.subr.bf16.mxu1 %v6276_v16 }
  0x4e   : > { %5548 = vmatmul.mubr.bf16.gmra.mrb[20].mxu1 %v870_v21 }
  0x4f   : > { %5551 = vmatprep.mubr.bf16.mxu1 %v871_v22  ;;  %5564 = vmatpush3.bf16.msra.mxu1 %v6276_v16 }
  0x50   : > { %5565 = vmatprep.subr.bf16.mxu1 %v6278_v31 }
  0x53   : > { %5566 = vmatpush3.bf16.msra.mxu1 %v6278_v31 }
  0x54   : > { %5567 = vmatprep.subr.bf16.mxu1 %v6280_v33 }
  0x56   : > { %5552 = vmatmul.mubr.bf16.gmra.mrb[24].mxu1 %v872_v27 }
  0x57   : > { %5555 = vmatprep.mubr.bf16.mxu1 %v873_v28  ;;  %5568 = vmatpush3.bf16.msra.mxu1 %v6280_v33 }
  0x58   : > { %5569 = vmatprep.subr.bf16.mxu1 %v6282_v35 }
  0x5b   : > { %5570 = vmatpush3.bf16.msra.mxu1 %v6282_v35 }
  0x5c   : > { %5571 = vmatprep.subr.bf16.mxu1 %v6284_v37 }
  0x5e   : > { %5556 = vmatmul.mubr.bf16.gmra.mrb[28].mxu1 %v874_v15 }
  0x5f   : > { %5572 = vmatpush3.bf16.msra.mxu1 %v6284_v37  ;;  %5575 = vmatprep.mubr.bf16.mxu1 %v1243_v40 }
  0x60   : > { %5573 = vmatprep.subr.bf16.mxu1 %v6286_v38 }
  0x63   : > { %5574 = vmatpush3.bf16.msra.mxu1 %v6286_v38 }
  0x64   : > { %5607 = vmatprep.subr.bf16.mxu1 %v6703_v42 }
  0xf9   : > { %v5513_v44 = vpop.f32.mrb[0].mxu1 }
  0xfa   : > { %v638_v46 = vmul.f32 %v5513_v44, %v6709_v43  ;;  %v566_v47 = vpop.f32.mrb[1].mxu1 }
  0xfb   : > { %v636_v48 = vmul.f32 %v6709_v43, %v566_v47  ;;  %v5514_v49 = vpop.f32.mrb[2].mxu1  ;;  %v6294_v47 = vld [vmem:[%s7230_s6 + $0x48] sm:$0xff]  }
  0xfc   : > { %v661_v50 = vadd.f32 %v6714_v45, %v638_v46  ;;  %v639_v51 = vmul.f32 %v5514_v49, %v6709_v43  ;;  %v569_v52 = vpop.f32.mrb[3].mxu1  ;;  %v6291_v46 = vld [vmem:[%s7230_s6 + $0x158] sm:$0xff]  }
  0xfd   : > { %v659_v53 = vadd.f32 %v6714_v45, %v636_v48  ;;  %v637_v54 = vmul.f32 %v6709_v43, %v569_v52 }
  0xfe   : > { %vm677_vm0 = vcmp.ge.f32.partialorder %v661_v50, 0.0  ;;  %v693_v55 = vmul.f32 0.01, %v661_v50  ;;  %v662_v56 = vadd.f32 %v6714_v45, %v639_v51 }
  0xff   : > { %vm675_vm1 = vcmp.ge.f32.partialorder %v659_v53, 0.0  ;;  %v691_v57 = vmul.f32 0.01, %v659_v53  ;;  %v660_v58 = vadd.f32 %v6714_v45, %v637_v54 }
 0x100   : > { %v709_v59 = vsel %vm677_vm0, %v661_v50, %v693_v55  ;;  %vm678_vm2 = vcmp.ge.f32.partialorder %v662_v56, 0.0  ;;  %v694_v60 = vmul.f32 0.01, %v662_v56 }
 0x101   : > { %726 = vst [vmem:[#allocation2 + $0x31] sm:$0xff] %v709_v59  ;;  %v707_v61 = vsel %vm675_vm1, %v659_v53, %v691_v57  ;;  %vm676_vm3 = vcmp.ge.f32.partialorder %v660_v58, 0.0  ;;  %v692_v62 = vmul.f32 0.01, %v660_v58  ;;  %v5517_v63 = vpop.f32.mrb[4].mxu1  ;;  %v6293_v57 = vld [vmem:[%s7230_s6 + $0x160] sm:$0xff]  }
 0x102   : > { %724 = vst [vmem:[#allocation2 + $0x19] sm:$0xff] %v707_v61  ;;  %v6724_v0 = vsel %vm678_vm2, %v662_v56, %v694_v60  ;;  %v642_v1 = vmul.f32 %v5517_v63, %v6709_v43  ;;  %v582_v2 = vpop.f32.mrb[5].mxu1 }
 0x103   : > { %727 = vst [vmem:[#allocation2 + $0x39] sm:$0xff] %v6724_v0  ;;  %v708_v3 = vsel %vm676_vm3, %v660_v58, %v692_v62  ;;  %v640_v6 = vmul.f32 %v6709_v43, %v582_v2  ;;  %v5518_v4 = vpop.f32.mrb[6].mxu1  ;;  %v2723_v5 = vpack.c.bf16 %v6724_v0, %v709_v59 }
 0x104   : > { %725 = vst [vmem:[#allocation2 + $0x21] sm:$0xff] %v708_v3  ;;  %v665_v7 = vadd.f32 %v6714_v45, %v642_v1  ;;  %v643_v8 = vmul.f32 %v5518_v4, %v6709_v43  ;;  %v585_v9 = vpop.f32.mrb[7].mxu1  ;;  %v6732_v11 = vpack.c.bf16 %v708_v3, %v707_v61 }
 0x105   : > { %v663_v12 = vadd.f32 %v6714_v45, %v640_v6  ;;  %v641_v13 = vmul.f32 %v6709_v43, %v585_v9 }
 0x106   : > { %vm681_vm4 = vcmp.ge.f32.partialorder %v665_v7, 0.0  ;;  %v697_v10 = vmul.f32 0.01, %v665_v7  ;;  %v666_v15 = vadd.f32 %v6714_v45, %v643_v8  ;;  %5767 = vmatprep.mubr.bf16.mxu0 %v6732_v11 }
 0x107   : > { %vm679_vm5 = vcmp.ge.f32.partialorder %v663_v12, 0.0  ;;  %v695_v16 = vmul.f32 0.01, %v663_v12  ;;  %v664_v17 = vadd.f32 %v6714_v45, %v641_v13  ;;  %5768 = vmatmul.mubr.bf16.vlgmr.msra.gmra.mrb[0].mxu0 %v2723_v5 }
 0x108   : > { %v713_v18 = vsel %vm681_vm4, %v665_v7, %v697_v10  ;;  %vm682_vm6 = vcmp.ge.f32.partialorder %v666_v15, 0.0  ;;  %v698_v19 = vmul.f32 0.01, %v666_v15  ;;  %5800 = vmatpush3.bf16.msra.mxu0 %v6288_v41  ;;  %v1183_v38 = vld [vmem:[#allocation2 + $0x30] sm:$0xff] }
 0x109   : > { %730 = vst [vmem:[#allocation2 + $0x61] sm:$0xff] %v713_v18  ;;  %v711_v20 = vsel %vm679_vm5, %v663_v12, %v695_v16  ;;  %vm680_vm7 = vcmp.ge.f32.partialorder %v664_v17, 0.0  ;;  %v696_v21 = vmul.f32 0.01, %v664_v17  ;;  %v5521_v22 = vpop.f32.mrb[8].mxu1  ;;  %5801 = vmatprep.subr.bf16.mxu0 %v6289_v14  ;;  %v1181_v31 = vld [vmem:[#allocation2 + $0x18] sm:$0xff] }
 0x10a   : > { %728 = vst [vmem:[#allocation2 + $0x49] sm:$0xff] %v711_v20  ;;  %v714_v24 = vsel %vm682_vm6, %v666_v15, %v698_v19  ;;  %v646_v25 = vmul.f32 %v5521_v22, %v6709_v43  ;;  %v598_v26 = vpop.f32.mrb[9].mxu1  ;;  %v1184_v27 = vld [vmem:[#allocation2 + $0x38] sm:$0xff]  ;;  %v6295_v12 = vld [vmem:[%s7230_s6 + $0x50] sm:$0xff]   ;;  %v6296_v15 = vld [vmem:[%s7230_s6 + $0x168] sm:$0xff]  }
 0x10b   : > { %731 = vst [vmem:[#allocation2 + $0x69] sm:$0xff] %v714_v24  ;;  %v712_v28 = vsel %vm680_vm7, %v664_v17, %v696_v21  ;;  %v644_v29 = vmul.f32 %v6709_v43, %v598_v26  ;;  %v5522_v30 = vpop.f32.mrb[10].mxu1  ;;  %v1182_v32 = vld [vmem:[#allocation2 + $0x20] sm:$0xff]  ;;  %v6747_v33 = vpack.c.bf16 %v714_v24, %v713_v18  ;;  %v1245_v44 = vpack.c.bf16 %v1184_v27, %v1183_v38  ;;  %v6297_v18 = vld [vmem:[%s7230_s6 + $0x58] sm:$0xff]   ;;  %v6299_v26 = vld [vmem:[%s7230_s6 + $0x170] sm:$0xff]  }
 0x10c   : > { %729 = vst [vmem:[#allocation2 + $0x51] sm:$0xff] %v712_v28  ;;  %v669_v34 = vadd.f32 %v6714_v45, %v646_v25  ;;  %v647_v35 = vmul.f32 %v5522_v30, %v6709_v43  ;;  %v601_v36 = vpop.f32.mrb[11].mxu1  ;;  %v1244_v37 = vpack.c.bf16 %v1182_v32, %v1181_v31  ;;  %v6751_v39 = vpack.c.bf16 %v712_v28, %v711_v20 }
 0x10d   : > { %5802 = vmatpush3.bf16.msra.mxu0 %v6289_v14  ;;  %v667_v40 = vadd.f32 %v6714_v45, %v644_v29  ;;  %v645_v41 = vmul.f32 %v6709_v43, %v601_v36 }
 0x10e   : > { %5803 = vmatprep.subr.bf16.mxu0 %v6290_v23  ;;  %vm685_vm8 = vcmp.ge.f32.partialorder %v669_v34, 0.0  ;;  %v701_v48 = vmul.f32 0.01, %v669_v34  ;;  %v670_v49 = vadd.f32 %v6714_v45, %v647_v35  ;;  %5576 = vmatmul.mubr.bf16.vlgmr.msra.gmra.mrb[32].mxu1 %v1244_v37 }
 0x10f   : > { %5771 = vmatprep.mubr.bf16.mxu0 %v6751_v39  ;;  %vm683_vm9 = vcmp.ge.f32.partialorder %v667_v40, 0.0  ;;  %v699_v50 = vmul.f32 0.01, %v667_v40  ;;  %v668_v51 = vadd.f32 %v6714_v45, %v645_v41  ;;  %5579 = vmatprep.mubr.bf16.mxu1 %v1245_v44 }
 0x110   : > { %5772 = vmatmul.mubr.bf16.gmra.mrb[4].mxu0 %v6747_v33  ;;  %v717_v52 = vsel %vm685_vm8, %v669_v34, %v701_v48  ;;  %vm686_vm10 = vcmp.ge.f32.partialorder %v670_v49, 0.0  ;;  %v702_v53 = vmul.f32 0.01, %v670_v49  ;;  %5608 = vmatpush3.bf16.msra.mxu1 %v6703_v42  ;;  %v1187_v8 = vld [vmem:[#allocation2 + $0x60] sm:$0xff] }
 0x111   : > { %5804 = vmatpush3.bf16.msra.mxu0 %v6290_v23  ;;  %734 = vst [vmem:[#allocation2 + $0x91] sm:$0xff] %v717_v52  ;;  %v715_v54 = vsel %vm683_vm9, %v667_v40, %v699_v50  ;;  %vm684_vm11 = vcmp.ge.f32.partialorder %v668_v51, 0.0  ;;  %v700_v55 = vmul.f32 0.01, %v668_v51  ;;  %v5525_v56 = vpop.f32.mrb[12].mxu1  ;;  %5609 = vmatprep.subr.bf16.mxu1 %v6294_v47  ;;  %v1185_v1 = vld [vmem:[#allocation2 + $0x48] sm:$0xff] }
 0x112   : > { %5805 = vmatprep.subr.bf16.mxu0 %v6291_v46  ;;  %732 = vst [vmem:[#allocation2 + $0x79] sm:$0xff] %v715_v54  ;;  %v718_v58 = vsel %vm686_vm10, %v670_v49, %v702_v53  ;;  %v650_v59 = vmul.f32 %v5525_v56, %v6709_v43  ;;  %v614_v60 = vpop.f32.mrb[13].mxu1  ;;  %v1188_v61 = vld [vmem:[#allocation2 + $0x68] sm:$0xff]  ;;  %v6298_v48 = vld [vmem:[%s7230_s6 + $0x60] sm:$0xff]  }
 0x113   : > { %735 = vst [vmem:[#allocation2 + $0x99] sm:$0xff] %v718_v58  ;;  %v716_v62 = vsel %vm684_vm11, %v668_v51, %v700_v55  ;;  %v648_v42 = vmul.f32 %v6709_v43, %v614_v60  ;;  %v5526_v63 = vpop.f32.mrb[14].mxu1  ;;  %v1186_v2 = vld [vmem:[#allocation2 + $0x50] sm:$0xff]  ;;  %v6771_v3 = vpack.c.bf16 %v718_v58, %v717_v52  ;;  %v1247_v10 = vpack.c.bf16 %v1188_v61, %v1187_v8  ;;  %v6302_v52 = vld [vmem:[%s7230_s6 + $0x178] sm:$0xff]   ;;  %v6300_v55 = vld [vmem:[%s7230_s6 + $0x68] sm:$0xff]  }
 0x114   : > { %733 = vst [vmem:[#allocation2 + $0x81] sm:$0xff] %v716_v62  ;;  %v673_v6 = vadd.f32 %v6714_v45, %v650_v59  ;;  %v651_v4 = vmul.f32 %v5526_v63, %v6709_v43  ;;  %v617_v5 = vpop.f32.mrb[15].mxu1  ;;  %v1246_v7 = vpack.c.bf16 %v1186_v2, %v1185_v1  ;;  %v6775_v9 = vpack.c.bf16 %v716_v62, %v715_v54 }
 0x115   : > { %5806 = vmatpush3.bf16.msra.mxu0 %v6291_v46  ;;  %v671_v13 = vadd.f32 %v6714_v45, %v648_v42  ;;  %v649_v14 = vmul.f32 %v6709_v43, %v617_v5  ;;  %5610 = vmatpush3.bf16.msra.mxu1 %v6294_v47  ;;  %v6827_v42 = vld [vmem:[%s7230_s6 + $0x180] sm:$0xff]  }
 0x116   : > { %5807 = vmatprep.subr.bf16.mxu0 %v6293_v57  ;;  %vm689_vm12 = vcmp.ge.f32.partialorder %v673_v6, 0.0  ;;  %v705_v16 = vmul.f32 0.01, %v673_v6  ;;  %v674_v17 = vadd.f32 %v6714_v45, %v651_v4  ;;  %5580 = vmatmul.mubr.bf16.gmra.mrb[36].mxu1 %v1246_v7 }
 0x117   : > { %5775 = vmatprep.mubr.bf16.mxu0 %v6775_v9  ;;  %vm687_vm13 = vcmp.ge.f32.partialorder %v671_v13, 0.0  ;;  %v703_v19 = vmul.f32 0.01, %v671_v13  ;;  %v672_v20 = vadd.f32 %v6714_v45, %v649_v14  ;;  %5583 = vmatprep.mubr.bf16.mxu1 %v1247_v10 }
 0x118   : > { %5776 = vmatmul.mubr.bf16.gmra.mrb[8].mxu0 %v6771_v3  ;;  %v721_v21 = vsel %vm689_vm12, %v673_v6, %v705_v16  ;;  %vm690_vm14 = vcmp.ge.f32.partialorder %v674_v17, 0.0  ;;  %v706_v22 = vmul.f32 0.01, %v674_v17  ;;  %5611 = vmatprep.subr.bf16.mxu1 %v6295_v12  ;;  %v1191_v46 = vld [vmem:[#allocation2 + $0x90] sm:$0xff] }
 0x119   : > { %5808 = vmatpush3.bf16.msra.mxu0 %v6293_v57  ;;  %738 = vst [vmem:[#allocation2 + $0xc1] sm:$0xff] %v721_v21  ;;  %v719_v23 = vsel %vm687_vm13, %v671_v13, %v703_v19  ;;  %vm688_vm15 = vcmp.ge.f32.partialorder %v672_v20, 0.0  ;;  %v704_v24 = vmul.f32 0.01, %v672_v20  ;;  %v5545_v25 = vpop.f32.mrb[16].mxu1  ;;  %5612 = vmatpush3.bf16.msra.mxu1 %v6295_v12  ;;  %v1189_v35 = vld [vmem:[#allocation2 + $0x78] sm:$0xff] }
 0x11a   : > { %5809 = vmatprep.subr.bf16.mxu0 %v6296_v15  ;;  %736 = vst [vmem:[#allocation2 + $0xa9] sm:$0xff] %v719_v23  ;;  %v722_v27 = vsel %vm690_vm14, %v674_v17, %v706_v22  ;;  %v1045_v28 = vmul.f32 %v5545_v25, %v6709_v43  ;;  %v973_v29 = vpop.f32.mrb[17].mxu1  ;;  %v1192_v30 = vld [vmem:[#allocation2 + $0x98] sm:$0xff]  ;;  %5613 = vmatprep.subr.bf16.mxu1 %v6297_v18  ;;  %v6301_v19 = vld [vmem:[%s7230_s6 + $0x70] sm:$0xff]  }
 0x11b   : > { %739 = vst [vmem:[#allocation2 + $0xc9] sm:$0xff] %v722_v27  ;;  %v720_v31 = vsel %vm688_vm15, %v672_v20, %v704_v24  ;;  %v1043_v32 = vmul.f32 %v6709_v43, %v973_v29  ;;  %v5546_v34 = vpop.f32.mrb[18].mxu1  ;;  %v1190_v36 = vld [vmem:[#allocation2 + $0x80] sm:$0xff]  ;;  %v6797_v37 = vpack.c.bf16 %v722_v27, %v721_v21  ;;  %v6810_v51 = vpack.c.bf16 %v1192_v30, %v1191_v46  ;;  %v6303_v25 = vld [vmem:[%s7230_s6 + $0x78] sm:$0xff]  }
 0x11c   : > { %737 = vst [vmem:[#allocation2 + $0xb1] sm:$0xff] %v720_v31  ;;  %v1068_v38 = vadd.f32 %v6714_v45, %v1045_v28  ;;  %v1046_v40 = vmul.f32 %v5546_v34, %v6709_v43  ;;  %v976_v41 = vpop.f32.mrb[19].mxu1  ;;  %v6801_v44 = vpack.c.bf16 %v1190_v36, %v1189_v35  ;;  %v6803_v47 = vpack.c.bf16 %v720_v31, %v719_v23 }
 0x11d   : > { %5810 = vmatpush3.bf16.msra.mxu0 %v6296_v15  ;;  %v1066_v49 = vadd.f32 %v6714_v45, %v1043_v32  ;;  %v1044_v50 = vmul.f32 %v6709_v43, %v976_v41  ;;  %5614 = vmatpush3.bf16.msra.mxu1 %v6297_v18 }
 0x11e   : > { %5811 = vmatprep.subr.bf16.mxu0 %v6299_v26  ;;  %vm1084_vm0 = vcmp.ge.f32.partialorder %v1068_v38, 0.0  ;;  %v1100_v53 = vmul.f32 0.01, %v1068_v38  ;;  %v1069_v54 = vadd.f32 %v6714_v45, %v1046_v40  ;;  %5584 = vmatmul.mubr.bf16.gmra.mrb[40].mxu1 %v6801_v44 }
 0x11f   : > { %5779 = vmatprep.mubr.bf16.mxu0 %v6803_v47  ;;  %vm1082_vm1 = vcmp.ge.f32.partialorder %v1066_v49, 0.0  ;;  %v1098_v56 = vmul.f32 0.01, %v1066_v49  ;;  %v1067_v57 = vadd.f32 %v6714_v45, %v1044_v50  ;;  %5587 = vmatprep.mubr.bf16.mxu1 %v6810_v51 }
 0x120   : > { %5780 = vmatmul.mubr.bf16.gmra.mrb[12].mxu0 %v6797_v37  ;;  %v1116_v58 = vsel %vm1084_vm0, %v1068_v38, %v1100_v53  ;;  %vm1085_vm2 = vcmp.ge.f32.partialorder %v1069_v54, 0.0  ;;  %v1101_v59 = vmul.f32 0.01, %v1069_v54  ;;  %5615 = vmatprep.subr.bf16.mxu1 %v6298_v48  ;;  %v1195_v17 = vld [vmem:[#allocation2 + $0xc0] sm:$0xff] }
 0x121   : > { %5812 = vmatpush3.bf16.msra.mxu0 %v6299_v26  ;;  %1133 = vst [vmem:[#allocation2 + $0xf1] sm:$0xff] %v1116_v58  ;;  %v1114_v60 = vsel %vm1082_vm1, %v1066_v49, %v1098_v56  ;;  %vm1083_vm3 = vcmp.ge.f32.partialorder %v1067_v57, 0.0  ;;  %v1099_v61 = vmul.f32 0.01, %v1067_v57  ;;  %v5549_v62 = vpop.f32.mrb[20].mxu1  ;;  %5616 = vmatpush3.bf16.msra.mxu1 %v6298_v48  ;;  %v1193_v8 = vld [vmem:[#allocation2 + $0xa8] sm:$0xff] }
 0x122   : > { %5813 = vmatprep.subr.bf16.mxu0 %v6302_v52  ;;  %1131 = vst [vmem:[#allocation2 + $0xd9] sm:$0xff] %v1114_v60  ;;  %v1117_v63 = vsel %vm1085_vm2, %v1069_v54, %v1101_v59  ;;  %v1049_v1 = vmul.f32 %v5549_v62, %v6709_v43  ;;  %v989_v2 = vpop.f32.mrb[21].mxu1  ;;  %v1196_v6 = vld [vmem:[#allocation2 + $0xc8] sm:$0xff]  ;;  %5617 = vmatprep.subr.bf16.mxu1 %v6300_v55 }
 0x123   : > { %1134 = vst [vmem:[#allocation2 + $0xf9] sm:$0xff] %v1117_v63  ;;  %v1115_v4 = vsel %vm1083_vm3, %v1067_v57, %v1099_v61  ;;  %v1047_v5 = vmul.f32 %v6709_v43, %v989_v2  ;;  %v5550_v7 = vpop.f32.mrb[22].mxu1  ;;  %v1194_v12 = vld [vmem:[#allocation2 + $0xb0] sm:$0xff]  ;;  %v6831_v13 = vpack.c.bf16 %v1117_v63, %v1116_v58  ;;  %v6844_v22 = vpack.c.bf16 %v1196_v6, %v1195_v17  ;;  %v6869_v58 = vld [vmem:[%s7230_s6 + $0x80] sm:$0xff]  }
 0x124   : > { %1132 = vst [vmem:[#allocation2 + $0xe1] sm:$0xff] %v1115_v4  ;;  %v1072_v14 = vadd.f32 %v6714_v45, %v1049_v1  ;;  %v1050_v10 = vmul.f32 %v5550_v7, %v6709_v43  ;;  %v992_v15 = vpop.f32.mrb[23].mxu1  ;;  %v6835_v16 = vpack.c.bf16 %v1194_v12, %v1193_v8  ;;  %v6837_v18 = vpack.c.bf16 %v1115_v4, %v1114_v60 }
 0x125   : > { %5814 = vmatpush3.bf16.msra.mxu0 %v6302_v52  ;;  %v1070_v20 = vadd.f32 %v6714_v45, %v1047_v5  ;;  %v1048_v21 = vmul.f32 %v6709_v43, %v992_v15  ;;  %5618 = vmatpush3.bf16.msra.mxu1 %v6300_v55 }
 0x126   : > { %5847 = vmatprep.subr.bf16.mxu0 %v6827_v42  ;;  %vm1088_vm4 = vcmp.ge.f32.partialorder %v1072_v14, 0.0  ;;  %v1104_v23 = vmul.f32 0.01, %v1072_v14  ;;  %v1073_v24 = vadd.f32 %v6714_v45, %v1050_v10  ;;  %5588 = vmatmul.mubr.bf16.gmra.mrb[44].mxu1 %v6835_v16 }
 0x127   : > { %5783 = vmatprep.mubr.bf16.mxu0 %v6837_v18  ;;  %vm1086_vm5 = vcmp.ge.f32.partialorder %v1070_v20, 0.0  ;;  %v1102_v26 = vmul.f32 0.01, %v1070_v20  ;;  %v1071_v27 = vadd.f32 %v6714_v45, %v1048_v21  ;;  %5591 = vmatprep.mubr.bf16.mxu1 %v6844_v22 }
 0x128   : > { %5784 = vmatmul.mubr.bf16.gmra.mrb[16].mxu0 %v6831_v13  ;;  %v1120_v28 = vsel %vm1088_vm4, %v1072_v14, %v1104_v23  ;;  %vm1089_vm6 = vcmp.ge.f32.partialorder %v1073_v24, 0.0  ;;  %v1105_v29 = vmul.f32 0.01, %v1073_v24  ;;  %5619 = vmatprep.subr.bf16.mxu1 %v6301_v19  ;;  %v1199_v56 = vld [vmem:[#allocation2 + $0xf0] sm:$0xff] }
 0x129   : > { %1137 = vst [vmem:[#allocation2 + $0x121] sm:$0xff] %v1120_v28  ;;  %v1118_v30 = vsel %vm1086_vm5, %v1070_v20, %v1102_v26  ;;  %vm1087_vm7 = vcmp.ge.f32.partialorder %v1071_v27, 0.0  ;;  %v1103_v31 = vmul.f32 0.01, %v1071_v27  ;;  %v5553_v32 = vpop.f32.mrb[24].mxu1  ;;  %5620 = vmatpush3.bf16.msra.mxu1 %v6301_v19  ;;  %v1197_v48 = vld [vmem:[#allocation2 + $0xd8] sm:$0xff] }
 0x12a   : > { %1135 = vst [vmem:[#allocation2 + $0x109] sm:$0xff] %v1118_v30  ;;  %v1121_v34 = vsel %vm1089_vm6, %v1073_v24, %v1105_v29  ;;  %v1053_v35 = vmul.f32 %v5553_v32, %v6709_v43  ;;  %v1005_v36 = vpop.f32.mrb[25].mxu1  ;;  %v1200_v38 = vld [vmem:[#allocation2 + $0xf8] sm:$0xff]  ;;  %5621 = vmatprep.subr.bf16.mxu1 %v6303_v25 }
 0x12b   : > { %1138 = vst [vmem:[#allocation2 + $0x129] sm:$0xff] %v1121_v34  ;;  %v1119_v40 = vsel %vm1087_vm7, %v1071_v27, %v1103_v31  ;;  %v1051_v41 = vmul.f32 %v6709_v43, %v1005_v36  ;;  %v5554_v46 = vpop.f32.mrb[26].mxu1  ;;  %v1198_v49 = vld [vmem:[#allocation2 + $0xe0] sm:$0xff]  ;;  %v6858_v50 = vpack.c.bf16 %v1121_v34, %v1120_v28  ;;  %v6873_v61 = vpack.c.bf16 %v1200_v38, %v1199_v56 }
 0x12c   : > { %1136 = vst [vmem:[#allocation2 + $0x111] sm:$0xff] %v1119_v40  ;;  %v1076_v52 = vadd.f32 %v6714_v45, %v1053_v35  ;;  %v1054_v53 = vmul.f32 %v5554_v46, %v6709_v43  ;;  %v1008_v54 = vpop.f32.mrb[27].mxu1  ;;  %v6862_v55 = vpack.c.bf16 %v1198_v49, %v1197_v48  ;;  %v6864_v57 = vpack.c.bf16 %v1119_v40, %v1118_v30 }
 0x12d   : > { %v1074_v59 = vadd.f32 %v6714_v45, %v1051_v41  ;;  %v1052_v60 = vmul.f32 %v6709_v43, %v1008_v54  ;;  %5622 = vmatpush3.bf16.msra.mxu1 %v6303_v25 }
 0x12e   : > { %vm1092_vm8 = vcmp.ge.f32.partialorder %v1076_v52, 0.0  ;;  %v1108_v62 = vmul.f32 0.01, %v1076_v52  ;;  %v1077_v63 = vadd.f32 %v6714_v45, %v1054_v53  ;;  %5592 = vmatmul.mubr.bf16.gmra.mrb[48].mxu1 %v6862_v55  ;;  %5787 = vmatprep.mubr.bf16.mxu0 %v6864_v57  ;;  %v3028_v53 = vld [vmem:[#allocation2 + $0x1a] sm:$0xff] }
 0x12f   : > { %vm1090_vm9 = vcmp.ge.f32.partialorder %v1074_v59, 0.0  ;;  %v1106_v1 = vmul.f32 0.01, %v1074_v59  ;;  %v1075_v2 = vadd.f32 %v6714_v45, %v1052_v60  ;;  %5595 = vmatprep.mubr.bf16.mxu1 %v6873_v61  ;;  %5655 = vmatprep.subr.bf16.mxu1 %v6869_v58  ;;  %v3029_v60 = vld [vmem:[#allocation2 + $0x22] sm:$0xff] }
 0x130   : > { %5788 = vmatmul.mubr.bf16.gmra.mrb[20].mxu0 %v6858_v50  ;;  %v1124_v6 = vsel %vm1092_vm8, %v1076_v52, %v1108_v62  ;;  %vm1093_vm10 = vcmp.ge.f32.partialorder %v1077_v63, 0.0  ;;  %v1109_v4 = vmul.f32 0.01, %v1077_v63  ;;  %v1203_v29 = vld [vmem:[#allocation2 + $0x120] sm:$0xff] }
 0x131   : > { %1141 = vst [vmem:[#allocation2 + $0x151] sm:$0xff] %v1124_v6  ;;  %v1122_v5 = vsel %vm1090_vm9, %v1074_v59, %v1106_v1  ;;  %vm1091_vm11 = vcmp.ge.f32.partialorder %v1075_v2, 0.0  ;;  %v1107_v7 = vmul.f32 0.01, %v1075_v2  ;;  %v5557_v8 = vpop.f32.mrb[28].mxu1  ;;  %v1201_v21 = vld [vmem:[#allocation2 + $0x108] sm:$0xff] }
 0x132   : > { %1139 = vst [vmem:[#allocation2 + $0x139] sm:$0xff] %v1122_v5  ;;  %v1125_v12 = vsel %vm1093_vm10, %v1077_v63, %v1109_v4  ;;  %v1057_v14 = vmul.f32 %v5557_v8, %v6709_v43  ;;  %v1021_v10 = vpop.f32.mrb[29].mxu1  ;;  %v1204_v15 = vld [vmem:[#allocation2 + $0x128] sm:$0xff]  ;;  %v3031_v8 = vld [vmem:[#allocation2 + $0x3a] sm:$0xff] }
 0x133   : > { %1142 = vst [vmem:[#allocation2 + $0x159] sm:$0xff] %v1125_v12  ;;  %v1123_v17 = vsel %vm1091_vm11, %v1075_v2, %v1107_v7  ;;  %v1055_v19 = vmul.f32 %v6709_v43, %v1021_v10  ;;  %v5558_v20 = vpop.f32.mrb[30].mxu1  ;;  %v1202_v23 = vld [vmem:[#allocation2 + $0x110] sm:$0xff]  ;;  %v6884_v24 = vpack.c.bf16 %v1125_v12, %v1124_v6  ;;  %v6894_v34 = vpack.c.bf16 %v1204_v15, %v1203_v29  ;;  %v1548_v4 = vld [vmem:[#allocation2 + $0x1] sm:$0xff] }
 0x134   : > { %1140 = vst [vmem:[#allocation2 + $0x141] sm:$0xff] %v1123_v17  ;;  %v1080_v25 = vadd.f32 %v6714_v45, %v1057_v14  ;;  %v1058_v26 = vmul.f32 %v5558_v20, %v6709_v43  ;;  %v1024_v27 = vpop.f32.mrb[31].mxu1  ;;  %v6888_v28 = vpack.c.bf16 %v1202_v23, %v1201_v21  ;;  %v6890_v30 = vpack.c.bf16 %v1123_v17, %v1122_v5  ;;  %v1549_v5 = vld [vmem:[#allocation2 + $0x9] sm:$0xff]  ;;  %v3030_v7 = vld [vmem:[#allocation2 + $0x32] sm:$0xff] }
 0x135   : > { %v1078_v31 = vadd.f32 %v6714_v45, %v1055_v19  ;;  %v1056_v32 = vmul.f32 %v6709_v43, %v1024_v27  ;;  %v6910_v6 = vpack.c.bf16 %v3029_v60, %v3028_v53  ;;  %v3032_v12 = vld [vmem:[#allocation2 + $0x4a] sm:$0xff]  ;;  %v1612_v15 = vpack.c.bf16 %v1549_v5, %v1548_v4  ;;  %v3033_v17 = vld [vmem:[#allocation2 + $0x52] sm:$0xff]  ;;  %v3034_v27 = vld [vmem:[#allocation2 + $0x62] sm:$0xff] }
 0x136   : > { %vm1096_vm12 = vcmp.ge.f32.partialorder %v1080_v25, 0.0  ;;  %v1112_v35 = vmul.f32 0.01, %v1080_v25  ;;  %v1081_v36 = vadd.f32 %v6714_v45, %v1058_v26  ;;  %5596 = vmatmul.mubr.bf16.gmra.mrb[52].mxu1 %v6888_v28  ;;  %5791 = vmatprep.mubr.bf16.mxu0 %v6890_v30  ;;  %v6916_v20 = vpack.c.bf16 %v3031_v8, %v3030_v7  ;;  %v6305_v21 = vld [vmem:[%s7230_s6 + $0x188] sm:$0xff]   ;;  %v6930_v26 = vld [vmem:[#allocation2 + $0x31] sm:$0xff]  ;;  %v3047_v8 = vld [vmem:[#allocation2 + $0xfa] sm:$0xff] }
 0x137   : > { %vm1094_vm13 = vcmp.ge.f32.partialorder %v1078_v31, 0.0  ;;  %v1110_v38 = vmul.f32 0.01, %v1078_v31  ;;  %v1079_v40 = vadd.f32 %v6714_v45, %v1056_v32  ;;  %5599 = vmatprep.mubr.bf16.mxu1 %v6894_v34  ;;  %v6922_v23 = vpack.c.bf16 %v3033_v17, %v3032_v12  ;;  %v3035_v29 = vld [vmem:[#allocation2 + $0x6a] sm:$0xff]  ;;  %v3037_v32 = vld [vmem:[#allocation2 + $0x82] sm:$0xff]  ;;  %v6313_v53 = vld [vmem:[%s7230_s6 + $0x98] sm:$0xff]  }
 0x138   : > { %5792 = vmatmul.mubr.bf16.gmra.mrb[24].mxu0 %v6884_v24  ;;  %v1128_v41 = vsel %vm1096_vm12, %v1080_v25, %v1112_v35  ;;  %vm1097_vm14 = vcmp.ge.f32.partialorder %v1081_v36, 0.0  ;;  %v1113_v43 = vmul.f32 0.01, %v1081_v36  ;;  %v1207_v63 = vld [vmem:[#allocation2 + $0x150] sm:$0xff]  ;;  %v1614_v35 = vpack.c.bf16 %v6724_v0, %v6930_v26  ;;  %v6309_v0 = vld [vmem:[%s7230_s6 + $0x1a0] sm:$0xff]   ;;  %v6316_v5 = vld [vmem:[%s7230_s6 + $0xa8] sm:$0xff]  }
 0x139   : > { %1145 = vst [vmem:[#allocation2 + $0x181] sm:$0xff] %v1128_v41  ;;  %v1126_v46 = vsel %vm1094_vm13, %v1078_v31, %v1110_v38  ;;  %vm1095_vm15 = vcmp.ge.f32.partialorder %v1079_v40, 0.0  ;;  %v1111_v48 = vmul.f32 0.01, %v1079_v40  ;;  %v1205_v56 = vld [vmem:[#allocation2 + $0x138] sm:$0xff]  ;;  %v6306_v25 = vld [vmem:[%s7230_s6 + $0x190] sm:$0xff]  }
 0x13a   : > { %1143 = vst [vmem:[#allocation2 + $0x169] sm:$0xff] %v1126_v46  ;;  %v1129_v49 = vsel %vm1097_vm14, %v1081_v36, %v1113_v43  ;;  %v1208_v52 = vld [vmem:[#allocation2 + $0x158] sm:$0xff]  ;;  %v6934_v36 = vpack.c.bf16 %v3035_v29, %v3034_v27  ;;  %v6311_v43 = vld [vmem:[%s7230_s6 + $0x90] sm:$0xff]  }
 0x13b   : > { %1146 = vst [vmem:[#allocation2 + $0x189] sm:$0xff] %v1129_v49  ;;  %v1127_v54 = vsel %vm1095_vm15, %v1079_v40, %v1111_v48  ;;  %v1206_v59 = vld [vmem:[#allocation2 + $0x140] sm:$0xff]  ;;  %v2737_v45 = vpack.c.bf16 %v1129_v49, %v1128_v41  ;;  %v6906_v2 = vpack.c.bf16 %v1208_v52, %v1207_v63  ;;  %v6310_v40 = vld [vmem:[%s7230_s6 + $0x88] sm:$0xff]   ;;  %v3041_v48 = vld [vmem:[#allocation2 + $0xb2] sm:$0xff] }
 0x13c   : > { %1144 = vst [vmem:[#allocation2 + $0x171] sm:$0xff] %v1127_v54  ;;  %v6902_v62 = vpack.c.bf16 %v1206_v59, %v1205_v56  ;;  %v6904_v1 = vpack.c.bf16 %v1127_v54, %v1126_v46  ;;  %v3036_v31 = vld [vmem:[#allocation2 + $0x7a] sm:$0xff]  ;;  %v3040_v46 = vld [vmem:[#allocation2 + $0xaa] sm:$0xff]  ;;  %v3042_v54 = vld [vmem:[#allocation2 + $0xc2] sm:$0xff] }
 0x13d   : > { %v6940_v38 = vpack.c.bf16 %v3037_v32, %v3036_v31  ;;  %v3039_v41 = vld [vmem:[#allocation2 + $0x9a] sm:$0xff]  ;;  %v6960_v52 = vpack.c.bf16 %v3041_v48, %v3040_v46  ;;  %v3043_v56 = vld [vmem:[#allocation2 + $0xca] sm:$0xff]  ;;  %v3046_v7 = vld [vmem:[#allocation2 + $0xf2] sm:$0xff] }
 0x13e   : > { %5600 = vmatmul.mubr.bf16.gmra.mrb[56].mxu1 %v6902_v62  ;;  %5795 = vmatprep.mubr.bf16.mxu0 %v6904_v1  ;;  %v6314_v59 = vld [vmem:[%s7230_s6 + $0xa0] sm:$0xff]   ;;  %v6974_v60 = vpack.c.bf16 %v3043_v56, %v3042_v54  ;;  %v6318_v63 = vld [vmem:[%s7230_s6 + $0x1b8] sm:$0xff]   ;;  %v6317_v12 = vld [vmem:[%s7230_s6 + $0xb0] sm:$0xff]  }
 0x13f   : > { %5603 = vmatprep.mubr.bf16.mxu1 %v6906_v2  ;;  %v6319_v17 = vld [vmem:[%s7230_s6 + $0xb8] sm:$0xff]   ;;  %v3053_v29 = vld [vmem:[#allocation2 + $0x142] sm:$0xff]  ;;  %v3399_v46 = vld [vmem:[#allocation2 + $0x30] sm:$0xff] }
 0x140   : > { %5796 = vmatmul.mubr.bf16.gmra.mrb[28].mxu0 %v2737_v45  ;;  %v3044_v45 = vld [vmem:[#allocation2 + $0xda] sm:$0xff]  ;;  %v3054_v32 = vld [vmem:[#allocation2 + $0x152] sm:$0xff]  ;;  %v3401_v54 = vld [vmem:[#allocation2 + $0x48] sm:$0xff] }
 0x141   : > { %5815 = vmatprep.mubr.bf16.mxu0 %v6910_v6  ;;  %v1209_v14 = vld [vmem:[#allocation2 + $0x168] sm:$0xff]  ;;  %v3052_v27 = vld [vmem:[#allocation2 + $0x13a] sm:$0xff] }
 0x143   : > { %v1210_v10 = vld [vmem:[#allocation2 + $0x170] sm:$0xff] }
 0x144   : > { %v6914_v19 = vpack.c.bf16 %v1210_v10, %v1209_v14  ;;  %v3049_v14 = vld [vmem:[#allocation2 + $0x112] sm:$0xff]  ;;  %v6996_v10 = vpack.c.bf16 %v3047_v8, %v3046_v7  ;;  %v3771_v7 = vld [vmem:[#allocation2 + $0x49] sm:$0xff] }
 0x146   : > { %5604 = vmatmul.mubr.bf16.gmra.mrb[60].mxu1 %v6914_v19 }
 0x147   : > { %5623 = vmatprep.mubr.bf16.mxu1 %v1612_v15 }
 0x148   : > { %5816 = vmatmul.mubr.bf16.vlgmr.msra.gmra.mrb[0].mxu0 %v6916_v20 }
 0x149   : > { %5819 = vmatprep.mubr.bf16.mxu0 %v6922_v23  ;;  %5848 = vmatpush3.bf16.msra.mxu0 %v6827_v42  ;;  %v6307_v42 = vld [vmem:[%s7230_s6 + $0x198] sm:$0xff]  }
 0x14a   : > { %5849 = vmatprep.subr.bf16.mxu0 %v6305_v21 }
 0x14d   : > { %5850 = vmatpush3.bf16.msra.mxu0 %v6305_v21  ;;  %v3050_v21 = vld [vmem:[#allocation2 + $0x122] sm:$0xff] }
 0x14e   : > { %5851 = vmatprep.subr.bf16.mxu0 %v6306_v25  ;;  %5624 = vmatmul.mubr.bf16.vlgmr.msra.gmra.mrb[32].mxu1 %v6732_v11  ;;  %v3038_v11 = vld [vmem:[#allocation2 + $0x92] sm:$0xff] }
 0x14f   : > { %5627 = vmatprep.mubr.bf16.mxu1 %v1614_v35  ;;  %5656 = vmatpush3.bf16.msra.mxu1 %v6869_v58  ;;  %v6954_v49 = vpack.c.bf16 %v3039_v41, %v3038_v11  ;;  %v6312_v58 = vld [vmem:[%s7230_s6 + $0x1a8] sm:$0xff]   ;;  %v3055_v35 = vld [vmem:[#allocation2 + $0x15a] sm:$0xff] }
 0x150   : > { %5820 = vmatmul.mubr.bf16.gmra.mrb[4].mxu0 %v6934_v36  ;;  %5657 = vmatprep.subr.bf16.mxu1 %v6310_v40  ;;  %v3400_v41 = vld [vmem:[#allocation2 + $0x38] sm:$0xff] }
 0x151   : > { %5823 = vmatprep.mubr.bf16.mxu0 %v6940_v38  ;;  %5852 = vmatpush3.bf16.msra.mxu0 %v6306_v25  ;;  %v3051_v25 = vld [vmem:[#allocation2 + $0x12a] sm:$0xff]  ;;  %v7030_v48 = vpack.c.bf16 %v3400_v41, %v3399_v46 }
 0x152   : > { %5853 = vmatprep.subr.bf16.mxu0 %v6307_v42  ;;  %v7011_v31 = vpack.c.bf16 %v3051_v25, %v3050_v21  ;;  %v3778_v21 = vld [vmem:[#allocation2 + $0x99] sm:$0xff]  ;;  %v3779_v41 = vld [vmem:[#allocation2 + $0xa9] sm:$0xff] }
 0x153   : > { %5658 = vmatpush3.bf16.msra.mxu1 %v6310_v40  ;;  %v3057_v40 = vld [vmem:[#allocation2 + $0x172] sm:$0xff] }
 0x154   : > { %5659 = vmatprep.subr.bf16.mxu1 %v6311_v43  ;;  %v3775_v25 = vld [vmem:[#allocation2 + $0x79] sm:$0xff] }
 0x155   : > { %5854 = vmatpush3.bf16.msra.mxu0 %v6307_v42  ;;  %v3056_v42 = vld [vmem:[#allocation2 + $0x16a] sm:$0xff] }
 0x156   : > { %5855 = vmatprep.subr.bf16.mxu0 %v6309_v0  ;;  %5628 = vmatmul.mubr.bf16.gmra.mrb[36].mxu1 %v6751_v39  ;;  %v6315_v39 = vld [vmem:[%s7230_s6 + $0x1b0] sm:$0xff]   ;;  %v7022_v11 = vpack.c.bf16 %v3057_v40, %v3056_v42  ;;  %v2297_v42 = vld [vmem:[#allocation2 + $0x80] sm:$0xff] }
 0x157   : > { %5631 = vmatprep.mubr.bf16.mxu1 %v6747_v33  ;;  %5660 = vmatpush3.bf16.msra.mxu1 %v6311_v43  ;;  %v3045_v33 = vld [vmem:[#allocation2 + $0xe2] sm:$0xff]  ;;  %v3780_v40 = vld [vmem:[#allocation2 + $0xb1] sm:$0xff] }
 0x158   : > { %5824 = vmatmul.mubr.bf16.gmra.mrb[8].mxu0 %v6954_v49  ;;  %5661 = vmatprep.subr.bf16.mxu1 %v6313_v53  ;;  %v6980_v4 = vpack.c.bf16 %v3045_v33, %v3044_v45  ;;  %v6322_v45 = vld [vmem:[%s7230_s6 + $0x1d0] sm:$0xff]   ;;  %v6326_v33 = vld [vmem:[%s7230_s6 + $0xc8] sm:$0xff]  }
 0x159   : > { %5827 = vmatprep.mubr.bf16.mxu0 %v6960_v52  ;;  %5856 = vmatpush3.bf16.msra.mxu0 %v6309_v0  ;;  %v7019_v0 = vpack.c.bf16 %v3055_v35, %v3054_v32  ;;  %v6340_v35 = vld [vmem:[%s7230_s6 + $0x220] sm:$0xff]  }
 0x15a   : > { %5857 = vmatprep.subr.bf16.mxu0 %v6312_v58 }
 0x15b   : > { %5662 = vmatpush3.bf16.msra.mxu1 %v6313_v53 }
 0x15c   : > { %5663 = vmatprep.subr.bf16.mxu1 %v6314_v59 }
 0x15d   : > { %5858 = vmatpush3.bf16.msra.mxu0 %v6312_v58  ;;  %v3402_v58 = vld [vmem:[#allocation2 + $0x50] sm:$0xff] }
 0x15e   : > { %5859 = vmatprep.subr.bf16.mxu0 %v6315_v39  ;;  %5632 = vmatmul.mubr.bf16.gmra.mrb[40].mxu1 %v6775_v9  ;;  %v6991_v9 = vld [vmem:[%s7230_s6 + $0x1c0] sm:$0xff]   ;;  %v7035_v56 = vpack.c.bf16 %v3402_v58, %v3401_v54  ;;  %v2301_v54 = vld [vmem:[#allocation2 + $0xb0] sm:$0xff] }
 0x15f   : > { %5635 = vmatprep.mubr.bf16.mxu1 %v6771_v3  ;;  %5664 = vmatpush3.bf16.msra.mxu1 %v6314_v59  ;;  %v3048_v3 = vld [vmem:[#allocation2 + $0x10a] sm:$0xff]  ;;  %v3403_v59 = vld [vmem:[#allocation2 + $0x60] sm:$0xff] }
 0x160   : > { %5828 = vmatmul.mubr.bf16.gmra.mrb[12].mxu0 %v6974_v60  ;;  %5665 = vmatprep.subr.bf16.mxu1 %v6316_v5  ;;  %v7000_v15 = vpack.c.bf16 %v3049_v14, %v3048_v3  ;;  %v6337_v3 = vld [vmem:[%s7230_s6 + $0x208] sm:$0xff]  }
 0x161   : > { %5831 = vmatprep.mubr.bf16.mxu0 %v6980_v4  ;;  %5860 = vmatpush3.bf16.msra.mxu0 %v6315_v39  ;;  %v3404_v39 = vld [vmem:[#allocation2 + $0x68] sm:$0xff] }
 0x162   : > { %5861 = vmatprep.subr.bf16.mxu0 %v6318_v63 }
 0x163   : > { %5666 = vmatpush3.bf16.msra.mxu1 %v6316_v5  ;;  %v3774_v5 = vld [vmem:[#allocation2 + $0x69] sm:$0xff] }
 0x164   : > { %5667 = vmatprep.subr.bf16.mxu1 %v6317_v12 }
 0x165   : > { %5862 = vmatpush3.bf16.msra.mxu0 %v6318_v63  ;;  %v6325_v63 = vld [vmem:[%s7230_s6 + $0x1e0] sm:$0xff]  }
 0x166   : > { %5895 = vmatprep.subr.bf16.mxu0 %v6991_v9  ;;  %5636 = vmatmul.mubr.bf16.gmra.mrb[44].mxu1 %v6803_v47  ;;  %v6324_v47 = vld [vmem:[%s7230_s6 + $0xc0] sm:$0xff]  }
 0x167   : > { %5639 = vmatprep.mubr.bf16.mxu1 %v6797_v37  ;;  %5668 = vmatpush3.bf16.msra.mxu1 %v6317_v12  ;;  %v7014_v37 = vpack.c.bf16 %v3053_v29, %v3052_v27  ;;  %v3773_v12 = vld [vmem:[#allocation2 + $0x61] sm:$0xff]  ;;  %v3777_v27 = vld [vmem:[#allocation2 + $0x91] sm:$0xff] }
 0x168   : > { %5832 = vmatmul.mubr.bf16.gmra.mrb[16].mxu0 %v6996_v10  ;;  %5669 = vmatprep.subr.bf16.mxu1 %v6319_v17  ;;  %v3835_v14 = vpack.c.bf16 %v3774_v5, %v3773_v12  ;;  %v6339_v29 = vld [vmem:[%s7230_s6 + $0x218] sm:$0xff]   ;;  %v3837_v32 = vpack.c.bf16 %v3778_v21, %v3777_v27  ;;  %v2306_v5 = vld [vmem:[#allocation2 + $0xf0] sm:$0xff]  ;;  %v2313_v21 = vld [vmem:[#allocation2 + $0x140] sm:$0xff] }
 0x169   : > { %5835 = vmatprep.mubr.bf16.mxu0 %v7000_v15  ;;  %v3798_v27 = vld [vmem:[#allocation2 + $0x189] sm:$0xff] }
 0x16b   : > { %5670 = vmatpush3.bf16.msra.mxu1 %v6319_v17  ;;  %v3776_v17 = vld [vmem:[#allocation2 + $0x81] sm:$0xff] }
 0x16c   : > { %5703 = vmatprep.subr.bf16.mxu1 %v6324_v47 }
 0x16e   : > { %5640 = vmatmul.mubr.bf16.gmra.mrb[48].mxu1 %v6837_v18  ;;  %v3059_v18 = vld [vmem:[#allocation2 + $0x18a] sm:$0xff] }
 0x16f   : > { %5643 = vmatprep.mubr.bf16.mxu1 %v6831_v13  ;;  %v3058_v13 = vld [vmem:[#allocation2 + $0x182] sm:$0xff] }
 0x170   : > { %5836 = vmatmul.mubr.bf16.gmra.mrb[20].mxu0 %v7011_v31  ;;  %v7027_v43 = vpack.c.bf16 %v3059_v18, %v3058_v13  ;;  %v3782_v13 = vld [vmem:[#allocation2 + $0xc9] sm:$0xff]  ;;  %v2296_v18 = vld [vmem:[#allocation2 + $0x78] sm:$0xff] }
 0x171   : > { %5839 = vmatprep.mubr.bf16.mxu0 %v7014_v37  ;;  %v2356_v46 = vpack.c.bf16 %v2297_v42, %v2296_v18 }
 0x176   : > { %5644 = vmatmul.mubr.bf16.gmra.mrb[52].mxu1 %v6864_v57  ;;  %v1919_v57 = vld [vmem:[#allocation2 + $0xa] sm:$0xff] }
 0x177   : > { %5647 = vmatprep.mubr.bf16.mxu1 %v6858_v50  ;;  %v1918_v50 = vld [vmem:[#allocation2 + $0x2] sm:$0xff] }
 0x178   : > { %5840 = vmatmul.mubr.bf16.gmra.mrb[24].mxu0 %v7019_v0  ;;  %v1982_v53 = vpack.c.bf16 %v1919_v57, %v1918_v50  ;;  %v3838_v50 = vpack.c.bf16 %v3780_v40, %v3779_v41  ;;  %v6341_v57 = vld [vmem:[%s7230_s6 + $0x228] sm:$0xff]   ;;  %v3799_v41 = vld [vmem:[#allocation2 + $0x199] sm:$0xff] }
 0x179   : > { %5843 = vmatprep.mubr.bf16.mxu0 %v7022_v11 }
 0x17e   : > { %5648 = vmatmul.mubr.bf16.gmra.mrb[56].mxu1 %v6890_v30  ;;  %v6321_v30 = vld [vmem:[%s7230_s6 + $0x1c8] sm:$0xff]  }
 0x17f   : > { %5651 = vmatprep.mubr.bf16.mxu1 %v6884_v24  ;;  %v7041_v24 = vpack.c.bf16 %v3404_v39, %v3403_v59  ;;  %v6342_v39 = vld [vmem:[%s7230_s6 + $0x230] sm:$0xff]  }
 0x180   : > { %5844 = vmatmul.mubr.bf16.gmra.mrb[28].mxu0 %v7027_v43  ;;  %v2298_v59 = vld [vmem:[#allocation2 + $0x90] sm:$0xff] }
 0x181   : > { %5863 = vmatprep.mubr.bf16.mxu0 %v7030_v48 }
 0x186   : > { %5652 = vmatmul.mubr.bf16.gmra.mrb[60].mxu1 %v6904_v1  ;;  %v6323_v1 = vld [vmem:[%s7230_s6 + $0x1d8] sm:$0xff]  }
 0x187   : > { %5671 = vmatprep.mubr.bf16.mxu1 %v1982_v53  ;;  %v2299_v53 = vld [vmem:[#allocation2 + $0x98] sm:$0xff] }
 0x188   : > { %5864 = vmatmul.mubr.bf16.vlgmr.msra.gmra.mrb[0].mxu0 %v7035_v56 }
 0x189   : > { %5867 = vmatprep.mubr.bf16.mxu0 %v7041_v24  ;;  %5896 = vmatpush3.bf16.msra.mxu0 %v6991_v9  ;;  %v2288_v9 = vld [vmem:[#allocation2 + $0x18] sm:$0xff] }
 0x18a   : > { %5897 = vmatprep.subr.bf16.mxu0 %v6321_v30 }
 0x18d   : > { %5898 = vmatpush3.bf16.msra.mxu0 %v6321_v30  ;;  %v3786_v30 = vld [vmem:[#allocation2 + $0xf9] sm:$0xff] }
 0x18e   : > { %5899 = vmatprep.subr.bf16.mxu0 %v6322_v45  ;;  %5672 = vmatmul.mubr.bf16.vlgmr.msra.gmra.mrb[32].mxu1 %v6910_v6  ;;  %v6327_v6 = vld [vmem:[%s7230_s6 + $0xd0] sm:$0xff]  }
 0x18f   : > { %5675 = vmatprep.mubr.bf16.mxu1 %v6916_v20  ;;  %5704 = vmatpush3.bf16.msra.mxu1 %v6324_v47  ;;  %v6331_v20 = vld [vmem:[%s7230_s6 + $0x1f0] sm:$0xff]   ;;  %v3836_v47 = vpack.c.bf16 %v3776_v17, %v3775_v25  ;;  %v2311_v17 = vld [vmem:[#allocation2 + $0x128] sm:$0xff] }
 0x190   : > { %5868 = vmatmul.mubr.bf16.gmra.mrb[4].mxu0 %v6801_v44  ;;  %5705 = vmatprep.subr.bf16.mxu1 %v6326_v33  ;;  %v6328_v44 = vld [vmem:[%s7230_s6 + $0x1e8] sm:$0xff]   ;;  %v3796_v25 = vld [vmem:[#allocation2 + $0x171] sm:$0xff] }
 0x191   : > { %5871 = vmatprep.mubr.bf16.mxu0 %v6810_v51  ;;  %5900 = vmatpush3.bf16.msra.mxu0 %v6322_v45  ;;  %v6329_v51 = vld [vmem:[%s7230_s6 + $0xd8] sm:$0xff]   ;;  %v2357_v45 = vpack.c.bf16 %v2299_v53, %v2298_v59 }
 0x192   : > { %5901 = vmatprep.subr.bf16.mxu0 %v6323_v1  ;;  %v4139_v53 = vld [vmem:[#allocation2 + $0x32] sm:$0xff] }
 0x193   : > { %5706 = vmatpush3.bf16.msra.mxu1 %v6326_v33  ;;  %v3783_v33 = vld [vmem:[#allocation2 + $0xd9] sm:$0xff] }
 0x194   : > { %5707 = vmatprep.subr.bf16.mxu1 %v6327_v6 }
 0x195   : > { %5902 = vmatpush3.bf16.msra.mxu0 %v6323_v1  ;;  %v2300_v1 = vld [vmem:[#allocation2 + $0xa8] sm:$0xff] }
 0x196   : > { %5903 = vmatprep.subr.bf16.mxu0 %v6325_v63  ;;  %5676 = vmatmul.mubr.bf16.gmra.mrb[36].mxu1 %v6922_v23  ;;  %v6330_v23 = vld [vmem:[%s7230_s6 + $0xe0] sm:$0xff]  }
 0x197   : > { %5679 = vmatprep.mubr.bf16.mxu1 %v6934_v36  ;;  %5708 = vmatpush3.bf16.msra.mxu1 %v6327_v6  ;;  %v6336_v36 = vld [vmem:[%s7230_s6 + $0x200] sm:$0xff]   ;;  %v3785_v6 = vld [vmem:[#allocation2 + $0xf1] sm:$0xff] }
 0x198   : > { %5872 = vmatmul.mubr.bf16.gmra.mrb[8].mxu0 %v6835_v16  ;;  %5709 = vmatprep.subr.bf16.mxu1 %v6329_v51  ;;  %v6334_v16 = vld [vmem:[%s7230_s6 + $0x1f8] sm:$0xff]  }
 0x199   : > { %5875 = vmatprep.mubr.bf16.mxu0 %v6844_v22  ;;  %5904 = vmatpush3.bf16.msra.mxu0 %v6325_v63  ;;  %v6332_v22 = vld [vmem:[%s7230_s6 + $0xe8] sm:$0xff]  }
 0x19a   : > { %5905 = vmatprep.subr.bf16.mxu0 %v6328_v44 }
 0x19b   : > { %5710 = vmatpush3.bf16.msra.mxu1 %v6329_v51  ;;  %v3841_v51 = vpack.c.bf16 %v3786_v30, %v3785_v6 }
 0x19c   : > { %5711 = vmatprep.subr.bf16.mxu1 %v6330_v23 }
 0x19d   : > { %5906 = vmatpush3.bf16.msra.mxu0 %v6328_v44  ;;  %v6343_v44 = vld [vmem:[%s7230_s6 + $0x238] sm:$0xff]  }
 0x19e   : > { %5907 = vmatprep.subr.bf16.mxu0 %v6331_v20  ;;  %5680 = vmatmul.mubr.bf16.gmra.mrb[40].mxu1 %v6940_v38  ;;  %v6333_v38 = vld [vmem:[%s7230_s6 + $0xf0] sm:$0xff]  }
 0x19f   : > { %5683 = vmatprep.mubr.bf16.mxu1 %v6954_v49  ;;  %5712 = vmatpush3.bf16.msra.mxu1 %v6330_v23  ;;  %v3427_v49 = vld [vmem:[#allocation2 + $0x180] sm:$0xff] }
 0x1a0   : > { %5876 = vmatmul.mubr.bf16.gmra.mrb[12].mxu0 %v6862_v55  ;;  %5713 = vmatprep.subr.bf16.mxu1 %v6332_v22  ;;  %v6335_v55 = vld [vmem:[%s7230_s6 + $0xf8] sm:$0xff]   ;;  %v2305_v23 = vld [vmem:[#allocation2 + $0xe0] sm:$0xff] }
 0x1a1   : > { %5879 = vmatprep.mubr.bf16.mxu0 %v6873_v61  ;;  %5908 = vmatpush3.bf16.msra.mxu0 %v6331_v20  ;;  %v3428_v61 = vld [vmem:[#allocation2 + $0x188] sm:$0xff] }
 0x1a2   : > { %5909 = vmatprep.subr.bf16.mxu0 %v6334_v16  ;;  %v2303_v20 = vld [vmem:[#allocation2 + $0xc8] sm:$0xff] }
 0x1a3   : > { %5714 = vmatpush3.bf16.msra.mxu1 %v6332_v22  ;;  %v2302_v22 = vld [vmem:[#allocation2 + $0xc0] sm:$0xff] }
 0x1a4   : > { %5715 = vmatprep.subr.bf16.mxu1 %v6333_v38 }
 0x1a5   : > { %5910 = vmatpush3.bf16.msra.mxu0 %v6334_v16  ;;  %v3788_v16 = vld [vmem:[#allocation2 + $0x111] sm:$0xff] }
 0x1a6   : > { %5943 = vmatprep.subr.bf16.mxu0 %v6336_v36  ;;  %5684 = vmatmul.mubr.bf16.gmra.mrb[44].mxu1 %v6960_v52  ;;  %v7109_v52 = vpack.c.bf16 %v3428_v61, %v3427_v49  ;;  %v3787_v61 = vld [vmem:[#allocation2 + $0x109] sm:$0xff] }
 0x1a7   : > { %5687 = vmatprep.mubr.bf16.mxu1 %v6974_v60  ;;  %5716 = vmatpush3.bf16.msra.mxu1 %v6333_v38  ;;  %v3770_v60 = vld [vmem:[#allocation2 + $0x39] sm:$0xff]  ;;  %v2359_v38 = vpack.c.bf16 %v2303_v20, %v2302_v22 }
 0x1a8   : > { %5880 = vmatmul.mubr.bf16.gmra.mrb[16].mxu0 %v6888_v28  ;;  %5717 = vmatprep.subr.bf16.mxu1 %v6335_v55  ;;  %v6345_v28 = vld [vmem:[#allocation2] sm:$0xff]  ;;  %v4147_v20 = vld [vmem:[#allocation2 + $0x92] sm:$0xff] }
 0x1a9   : > { %5883 = vmatprep.mubr.bf16.mxu0 %v6894_v34  ;;  %v3478_v34 = vpack.c.bf16 %v6345_v28, %v6345_v28  ;;  %v3842_v28 = vpack.c.bf16 %v3788_v16, %v3787_v61  ;;  %v4152_v61 = vld [vmem:[#allocation2 + $0xca] sm:$0xff] }
 0x1ab   : > { %5718 = vmatpush3.bf16.msra.mxu1 %v6335_v55  ;;  %v2304_v55 = vld [vmem:[#allocation2 + $0xd8] sm:$0xff] }
 0x1ac   : > { %v2360_v49 = vpack.c.bf16 %v2305_v23, %v2304_v55  ;;  %v4148_v23 = vld [vmem:[#allocation2 + $0x9a] sm:$0xff]  ;;  %v4151_v55 = vld [vmem:[#allocation2 + $0xc2] sm:$0xff] }
 0x1ad   : > { %v4207_v22 = vpack.c.bf16 %v4148_v23, %v4147_v20 }
 0x1ae   : > { %5688 = vmatmul.mubr.bf16.gmra.mrb[48].mxu1 %v6980_v4  ;;  %v3772_v4 = vld [vmem:[#allocation2 + $0x51] sm:$0xff] }
 0x1af   : > { %5691 = vmatprep.mubr.bf16.mxu1 %v6996_v10 }
 0x1b0   : > { %5884 = vmatmul.mubr.bf16.gmra.mrb[20].mxu0 %v6902_v62  ;;  %v3833_v62 = vpack.c.bf16 %v3770_v60, %v6930_v26  ;;  %v6338_v26 = vld [vmem:[%s7230_s6 + $0x210] sm:$0xff]  }
 0x1b1   : > { %5887 = vmatprep.mubr.bf16.mxu0 %v6906_v2  ;;  %v2289_v2 = vld [vmem:[#allocation2 + $0x20] sm:$0xff] }
 0x1b2   : > { %v2352_v8 = vpack.c.bf16 %v2289_v2, %v2288_v9  ;;  %v2309_v2 = vld [vmem:[#allocation2 + $0x110] sm:$0xff]  ;;  %v3794_v9 = vld [vmem:[#allocation2 + $0x159] sm:$0xff] }
 0x1b6   : > { %5692 = vmatmul.mubr.bf16.gmra.mrb[52].mxu1 %v7000_v15 }
 0x1b7   : > { %5695 = vmatprep.mubr.bf16.mxu1 %v7011_v31 }
 0x1b8   : > { %5888 = vmatmul.mubr.bf16.gmra.mrb[24].mxu0 %v6914_v19  ;;  %v3834_v19 = vpack.c.bf16 %v3772_v4, %v3771_v7  ;;  %v3792_v4 = vld [vmem:[#allocation2 + $0x141] sm:$0xff] }
 0x1b9   : > { %5891 = vmatprep.mubr.bf16.mxu0 %v7109_v52 }
 0x1be   : > { %5696 = vmatmul.mubr.bf16.gmra.mrb[56].mxu1 %v7014_v37 }
 0x1bf   : > { %5699 = vmatprep.mubr.bf16.mxu1 %v7019_v0 }
 0x1c0   : > { %5892 = vmatmul.mubr.bf16.gmra.mrb[28].mxu0 %v3478_v34  ;;  %v3789_v34 = vld [vmem:[#allocation2 + $0x121] sm:$0xff] }
 0x1c1   : > { %5911 = vmatprep.mubr.bf16.mxu0 %v3833_v62  ;;  %v2307_v62 = vld [vmem:[#allocation2 + $0xf8] sm:$0xff] }
 0x1c2   : > { %v2361_v7 = vpack.c.bf16 %v2307_v62, %v2306_v5  ;;  %v4169_v62 = vld [vmem:[#allocation2 + $0x19a] sm:$0xff] }
 0x1c6   : > { %5700 = vmatmul.mubr.bf16.gmra.mrb[60].mxu1 %v7022_v11 }
 0x1c7   : > { %5719 = vmatprep.mubr.bf16.mxu1 %v2352_v8  ;;  %v2308_v8 = vld [vmem:[#allocation2 + $0x108] sm:$0xff] }
 0x1c8   : > { %5912 = vmatmul.mubr.bf16.vlgmr.msra.gmra.mrb[0].mxu0 %v3834_v19  ;;  %v3791_v19 = vld [vmem:[#allocation2 + $0x139] sm:$0xff]  ;;  %v2362_v12 = vpack.c.bf16 %v2309_v2, %v2308_v8  ;;  %v4170_v2 = vld [vmem:[#allocation2 + $0x1a2] sm:$0xff] }
 0x1c9   : > { %5915 = vmatprep.mubr.bf16.mxu0 %v3835_v14  ;;  %5944 = vmatpush3.bf16.msra.mxu0 %v6336_v36  ;;  %v3790_v36 = vld [vmem:[#allocation2 + $0x129] sm:$0xff]  ;;  %v3793_v14 = vld [vmem:[#allocation2 + $0x151] sm:$0xff] }
 0x1ca   : > { %5945 = vmatprep.subr.bf16.mxu0 %v6337_v3  ;;  %v3843_v60 = vpack.c.bf16 %v3790_v36, %v3789_v34  ;;  %v4149_v36 = vld [vmem:[#allocation2 + $0xaa] sm:$0xff]  ;;  %v4154_v34 = vld [vmem:[#allocation2 + $0xe2] sm:$0xff] }
 0x1cd   : > { %5946 = vmatpush3.bf16.msra.mxu0 %v6337_v3  ;;  %v3844_v3 = vpack.c.bf16 %v3792_v4, %v3791_v19  ;;  %v4218_v4 = vpack.c.bf16 %v4170_v2, %v4169_v62 }
 0x1ce   : > { %5947 = vmatprep.subr.bf16.mxu0 %v6338_v26  ;;  %5720 = vmatmul.mubr.bf16.vlgmr.msra.gmra.mrb[32].mxu1 %v7030_v48  ;;  %v3781_v48 = vld [vmem:[#allocation2 + $0xc1] sm:$0xff] }
 0x1cf   : > { %5723 = vmatprep.mubr.bf16.mxu1 %v7035_v56  ;;  %v3839_v58 = vpack.c.bf16 %v3782_v13, %v3781_v48  ;;  %v3784_v56 = vld [vmem:[#allocation2 + $0xe1] sm:$0xff]  ;;  %v2317_v48 = vld [vmem:[#allocation2 + $0x170] sm:$0xff] }
 0x1d0   : > { %5916 = vmatmul.mubr.bf16.gmra.mrb[4].mxu0 %v3836_v47  ;;  %v3840_v63 = vpack.c.bf16 %v3784_v56, %v3783_v33  ;;  %v2310_v47 = vld [vmem:[#allocation2 + $0x120] sm:$0xff]  ;;  %v2316_v56 = vld [vmem:[#allocation2 + $0x168] sm:$0xff] }
 0x1d1   : > { %5919 = vmatprep.mubr.bf16.mxu0 %v3837_v32  ;;  %5948 = vmatpush3.bf16.msra.mxu0 %v6338_v26  ;;  %v3845_v26 = vpack.c.bf16 %v3794_v9, %v3793_v14  ;;  %v2312_v32 = vld [vmem:[#allocation2 + $0x138] sm:$0xff]  ;;  %v3797_v13 = vld [vmem:[#allocation2 + $0x181] sm:$0xff]  ;;  %v2366_v59 = vpack.c.bf16 %v2317_v48, %v2316_v56 }
 0x1d2   : > { %5949 = vmatprep.subr.bf16.mxu0 %v6339_v29  ;;  %v2364_v42 = vpack.c.bf16 %v2313_v21, %v2312_v32  ;;  %v3847_v18 = vpack.c.bf16 %v3798_v27, %v3797_v13  ;;  %v4143_v33 = vld [vmem:[#allocation2 + $0x62] sm:$0xff] }
 0x1d5   : > { %5950 = vmatpush3.bf16.msra.mxu0 %v6339_v29  ;;  %v2363_v29 = vpack.c.bf16 %v2311_v17, %v2310_v47 }
 0x1d6   : > { %5951 = vmatprep.subr.bf16.mxu0 %v6340_v35  ;;  %5724 = vmatmul.mubr.bf16.gmra.mrb[36].mxu1 %v7041_v24  ;;  %v2358_v24 = vpack.c.bf16 %v2301_v54, %v2300_v1  ;;  %v4142_v1 = vld [vmem:[#allocation2 + $0x52] sm:$0xff] }
 0x1d7   : > { %5727 = vmatprep.mubr.bf16.mxu1 %v2356_v46  ;;  %v3800_v46 = vld [vmem:[#allocation2 + $0x1a1] sm:$0xff] }
 0x1d8   : > { %5920 = vmatmul.mubr.bf16.gmra.mrb[8].mxu0 %v3838_v50  ;;  %v2315_v50 = vld [vmem:[#allocation2 + $0x158] sm:$0xff] }
 0x1d9   : > { %5923 = vmatprep.mubr.bf16.mxu0 %v3839_v58  ;;  %5952 = vmatpush3.bf16.msra.mxu0 %v6340_v35  ;;  %v3795_v35 = vld [vmem:[#allocation2 + $0x169] sm:$0xff]  ;;  %v3848_v58 = vpack.c.bf16 %v3800_v46, %v3799_v41 }
 0x1da   : > { %5953 = vmatprep.subr.bf16.mxu0 %v6341_v57  ;;  %v3846_v40 = vpack.c.bf16 %v3796_v25, %v3795_v35 }
 0x1dd   : > { %5954 = vmatpush3.bf16.msra.mxu0 %v6341_v57  ;;  %v2314_v57 = vld [vmem:[#allocation2 + $0x150] sm:$0xff] }
 0x1de   : > { %5955 = vmatprep.subr.bf16.mxu0 %v6342_v39  ;;  %5728 = vmatmul.mubr.bf16.gmra.mrb[40].mxu1 %v2357_v45  ;;  %v2365_v54 = vpack.c.bf16 %v2315_v50, %v2314_v57  ;;  %v4141_v45 = vld [vmem:[#allocation2 + $0x4a] sm:$0xff] }
 0x1df   : > { %5731 = vmatprep.mubr.bf16.mxu1 %v2358_v24  ;;  %v4144_v24 = vld [vmem:[#allocation2 + $0x6a] sm:$0xff] }
 0x1e0   : > { %5924 = vmatmul.mubr.bf16.gmra.mrb[12].mxu0 %v3840_v63  ;;  %v4204_v63 = vpack.c.bf16 %v4142_v1, %v4141_v45  ;;  %v4205_v6 = vpack.c.bf16 %v4144_v24, %v4143_v33 }
 0x1e1   : > { %5927 = vmatprep.mubr.bf16.mxu0 %v3841_v51  ;;  %5956 = vmatpush3.bf16.msra.mxu0 %v6342_v39  ;;  %v4140_v39 = vld [vmem:[#allocation2 + $0x3a] sm:$0xff]  ;;  %v4146_v51 = vld [vmem:[#allocation2 + $0x82] sm:$0xff] }
 0x1e2   : > { %5957 = vmatprep.subr.bf16.mxu0 %v6343_v44  ;;  %v4203_v30 = vpack.c.bf16 %v4140_v39, %v4139_v53 }
 0x1e5   : > { %5958 = vmatpush3.bf16.msra.mxu0 %v6343_v44  ;;  %v4145_v44 = vld [vmem:[#allocation2 + $0x7a] sm:$0xff] }
 0x1e6   : > { %5732 = vmatmul.mubr.bf16.gmra.mrb[44].mxu1 %v2359_v38  ;;  %v4206_v16 = vpack.c.bf16 %v4146_v51, %v4145_v44  ;;  %v4150_v38 = vld [vmem:[#allocation2 + $0xb2] sm:$0xff] }
 0x1e7   : > { %5735 = vmatprep.mubr.bf16.mxu1 %v2360_v49  ;;  %v4208_v49 = vpack.c.bf16 %v4150_v38, %v4149_v36 }
 0x1e8   : > { %5928 = vmatmul.mubr.bf16.gmra.mrb[16].mxu0 %v3842_v28  ;;  %v4209_v28 = vpack.c.bf16 %v4152_v61, %v4151_v55 }
 0x1e9   : > { %5931 = vmatprep.mubr.bf16.mxu0 %v3843_v60 }
 0x1ee   : > { %5736 = vmatmul.mubr.bf16.gmra.mrb[48].mxu1 %v2361_v7 }
 0x1ef   : > { %5739 = vmatprep.mubr.bf16.mxu1 %v2362_v12 }
 0x1f0   : > { %5932 = vmatmul.mubr.bf16.gmra.mrb[20].mxu0 %v3844_v3 }
 0x1f1   : > { %5935 = vmatprep.mubr.bf16.mxu0 %v3845_v26 }
 0x1f6   : > { %5740 = vmatmul.mubr.bf16.gmra.mrb[52].mxu1 %v2363_v29 }
 0x1f7   : > { %5743 = vmatprep.mubr.bf16.mxu1 %v2364_v42 }
 0x1f8   : > { %5936 = vmatmul.mubr.bf16.gmra.mrb[24].mxu0 %v3846_v40 }
 0x1f9   : > { %5939 = vmatprep.mubr.bf16.mxu0 %v3847_v18 }
 0x1fe   : > { %5744 = vmatmul.mubr.bf16.gmra.mrb[56].mxu1 %v2365_v54 }
 0x1ff   : > { %5747 = vmatprep.mubr.bf16.mxu1 %v2366_v59 }
 0x200   : > { %5940 = vmatmul.mubr.bf16.gmra.mrb[28].mxu0 %v3848_v58 }
 0x201   : > { %5959 = vmatprep.mubr.bf16.mxu0 %v4203_v30 }
 0x206   : > { %5748 = vmatmul.mubr.bf16.gmra.mrb[60].mxu1 %v7109_v52  ;;  %v4153_v52 = vld [vmem:[#allocation2 + $0xda] sm:$0xff] }
 0x207   : > { %v4210_v60 = vpack.c.bf16 %v4154_v34, %v4153_v52 }
 0x208   : > { %5960 = vmatmul.mubr.bf16.vlgmr.msra.gmra.mrb[0].mxu0 %v4204_v63 }
 0x209   : > { %5963 = vmatprep.mubr.bf16.mxu0 %v4205_v6 }
 0x210   : > { %5964 = vmatmul.mubr.bf16.gmra.mrb[4].mxu0 %v4206_v16 }
 0x211   : > { %5967 = vmatprep.mubr.bf16.mxu0 %v4207_v22 }
 0x218   : > { %5968 = vmatmul.mubr.bf16.gmra.mrb[8].mxu0 %v4208_v49 }
 0x219   : > { %5971 = vmatprep.mubr.bf16.mxu0 %v4209_v28 }
 0x220   : > { %5972 = vmatmul.mubr.bf16.gmra.mrb[12].mxu0 %v4210_v60 }
 0x221   : > { %5975 = vmatprep.mubr.bf16.mxu0 %v6996_v10 }
 0x228   : > { %5976 = vmatmul.mubr.bf16.gmra.mrb[16].mxu0 %v7000_v15 }
 0x229   : > { %5979 = vmatprep.mubr.bf16.mxu0 %v7011_v31 }
 0x230   : > { %5980 = vmatmul.mubr.bf16.gmra.mrb[20].mxu0 %v7014_v37 }
 0x231   : > { %5983 = vmatprep.mubr.bf16.mxu0 %v7019_v0 }
 0x238   : > { %5984 = vmatmul.mubr.bf16.gmra.mrb[24].mxu0 %v7022_v11 }
 0x239   : > { %5987 = vmatprep.mubr.bf16.mxu0 %v7027_v43 }
 0x240   : > { %5988 = vmatmul.mubr.bf16.gmra.mrb[28].mxu0 %v4218_v4 }
 0x2a1   : > { %v5721_v5 = vpop.f32.mrb[32].mxu1 }
 0x2a2   : > { %v2467_v9 = vpop.f32.mrb[33].mxu1 }
 0x2a3   : > { %v5722_v7 = vpop.f32.mrb[34].mxu1 }
 0x2a4   : > { %v2470_v10 = vpop.f32.mrb[35].mxu1 }
 0x2a9   : > { %v5725_v8 = vpop.f32.mrb[36].mxu1 }
 0x2aa   : > { %v2483_v15 = vpop.f32.mrb[37].mxu1 }
 0x2ab   : > { %v5726_v19 = vpop.f32.mrb[38].mxu1 }
 0x2ac   : > { %v2486_v31 = vpop.f32.mrb[39].mxu1 }
 0x2b1   : > { %v5729_v12 = vpop.f32.mrb[40].mxu1 }
 0x2b2   : > { %v2499_v37 = vpop.f32.mrb[41].mxu1 }
 0x2b3   : > { %v5730_v3 = vpop.f32.mrb[42].mxu1 }
 0x2b4   : > { %v2502_v0 = vpop.f32.mrb[43].mxu1 }
 0x2b9   : > { %v5733_v14 = vpop.f32.mrb[44].mxu1 }
 0x2ba   : > { %v2515_v11 = vpop.f32.mrb[45].mxu1 }
 0x2bb   : > { %v5734_v26 = vpop.f32.mrb[46].mxu1 }
 0x2bc   : > { %v2518_v43 = vpop.f32.mrb[47].mxu1 }
 0x2c1   : > { %v7150_v17 = vpop.f32.mrb[48].mxu1 }
 0x2c2   : > { %v7152_v21 = vpop.f32.mrb[49].mxu1 }
 0x2c3   : > { %v7154_v25 = vpop.f32.mrb[50].mxu1 }
 0x2c4   : > { %v7156_v47 = vpop.f32.mrb[51].mxu1 }
 0x2c9   : > { %v7158_v27 = vpop.f32.mrb[52].mxu1 }
 0x2ca   : > { %v7160_v29 = vpop.f32.mrb[53].mxu1 }
 0x2cb   : > { %v7162_v32 = vpop.f32.mrb[54].mxu1 }
 0x2cc   : > { %v7164_v35 = vpop.f32.mrb[55].mxu1 }
 0x2d1   : > { %v7166_v42 = vpop.f32.mrb[56].mxu1 }
 0x2d2   : > { %v7168_v40 = vpop.f32.mrb[57].mxu1 }
 0x2d3   : > { %v7170_v13 = vpop.f32.mrb[58].mxu1 }
 0x2d4   : > { %v7172_v18 = vpop.f32.mrb[59].mxu1 }
 0x2d9   : > { %v7174_v41 = vpop.f32.mrb[60].mxu1 }
 0x2da   : > { %v7176_v46 = vpop.f32.mrb[61].mxu1 }
 0x2db   : > { %v5961_v50 = vpop.f32.mrb[0].mxu0  ;;  %v7178_v48 = vpop.f32.mrb[62].mxu1 }
 0x2dc   : > { %v5991_v57 = vadd.f32 %v5961_v50, %v5721_v5  ;;  %v4318_v58 = vpop.f32.mrb[1].mxu0  ;;  %v7180_v53 = vpop.f32.mrb[63].mxu1 }
 0x2dd   : > { %v5992_v39 = vadd.f32 %v4318_v58, %v2467_v9  ;;  %v5962_v54 = vpop.f32.mrb[2].mxu0 }
 0x2de   : > { %v5993_v56 = vadd.f32 %v5962_v54, %v5722_v7  ;;  %v4321_v59 = vpop.f32.mrb[3].mxu0 }
 0x2df   : > { %v5994_v30 = vadd.f32 %v4321_v59, %v2470_v10 }
 0x2e0   : > { %v5145_v45 = vpack.c.bf16 %v5993_v56, %v5991_v57 }
 0x2e1   : > { %v5140_v1 = vpack.c.bf16 %v5994_v30, %v5992_v39 }
 0x2e2   : > { %5232 = vst [vmem:[%s7187_s14 + $0x8] sm:$0xff] %v5145_v45  }
 0x2e3   : > { %5141 = vst [vmem:[%s7187_s14] sm:$0xff] %v5140_v1   ;;  %v5965_v33 = vpop.f32.mrb[4].mxu0 }
 0x2e4   : > { %v5995_v24 = vadd.f32 %v5965_v33, %v5725_v8  ;;  %v4334_v63 = vpop.f32.mrb[5].mxu0 }
 0x2e5   : > { %v5996_v6 = vadd.f32 %v4334_v63, %v2483_v15  ;;  %v5966_v44 = vpop.f32.mrb[6].mxu0 }
 0x2e6   : > { %v5997_v51 = vadd.f32 %v5966_v44, %v5726_v19  ;;  %v4337_v20 = vpop.f32.mrb[7].mxu0 }
 0x2e7   : > { %v5998_v23 = vadd.f32 %v4337_v20, %v2486_v31 }
 0x2e8   : > { %v5155_v16 = vpack.c.bf16 %v5997_v51, %v5995_v24 }
 0x2e9   : > { %v5150_v22 = vpack.c.bf16 %v5998_v23, %v5996_v6 }
 0x2ea   : > { %5234 = vst [vmem:[%s7187_s14 + $0x18] sm:$0xff] %v5155_v16  }
 0x2eb   : > { %5233 = vst [vmem:[%s7187_s14 + $0x10] sm:$0xff] %v5150_v22   ;;  %v5969_v36 = vpop.f32.mrb[8].mxu0 }
 0x2ec   : > { %v5999_v38 = vadd.f32 %v5969_v36, %v5729_v12  ;;  %v4350_v55 = vpop.f32.mrb[9].mxu0 }
 0x2ed   : > { %v6000_v61 = vadd.f32 %v4350_v55, %v2499_v37  ;;  %v5970_v49 = vpop.f32.mrb[10].mxu0 }
 0x2ee   : > { %v6001_v28 = vadd.f32 %v5970_v49, %v5730_v3  ;;  %v4353_v52 = vpop.f32.mrb[11].mxu0 }
 0x2ef   : > { %v6002_v34 = vadd.f32 %v4353_v52, %v2502_v0 }
 0x2f0   : > { %v5165_v60 = vpack.c.bf16 %v6001_v28, %v5999_v38 }
 0x2f1   : > { %v5160_v62 = vpack.c.bf16 %v6002_v34, %v6000_v61 }
 0x2f2   : > { %5236 = vst [vmem:[%s7187_s14 + $0x28] sm:$0xff] %v5165_v60  }
 0x2f3   : > { %5235 = vst [vmem:[%s7187_s14 + $0x20] sm:$0xff] %v5160_v62   ;;  %v5973_v2 = vpop.f32.mrb[12].mxu0 }
 0x2f4   : > { %v6003_v4 = vadd.f32 %v5973_v2, %v5733_v14  ;;  %v4366_v5 = vpop.f32.mrb[13].mxu0 }
 0x2f5   : > { %v6004_v9 = vadd.f32 %v4366_v5, %v2515_v11  ;;  %v5974_v7 = vpop.f32.mrb[14].mxu0 }
 0x2f6   : > { %v6005_v10 = vadd.f32 %v5974_v7, %v5734_v26  ;;  %v4369_v8 = vpop.f32.mrb[15].mxu0 }
 0x2f7   : > { %v6006_v15 = vadd.f32 %v4369_v8, %v2518_v43 }
 0x2f8   : > { %v5175_v19 = vpack.c.bf16 %v6005_v10, %v6003_v4 }
 0x2f9   : > { %v5170_v31 = vpack.c.bf16 %v6006_v15, %v6004_v9 }
 0x2fa   : > { %5238 = vst [vmem:[%s7187_s14 + $0x38] sm:$0xff] %v5175_v19  }
 0x2fb   : > { %5237 = vst [vmem:[%s7187_s14 + $0x30] sm:$0xff] %v5170_v31   ;;  %v5977_v12 = vpop.f32.mrb[16].mxu0 }
 0x2fc   : > { %v6007_v37 = vadd.f32 %v5977_v12, %v7150_v17  ;;  %v4382_v3 = vpop.f32.mrb[17].mxu0 }
 0x2fd   : > { %v6008_v0 = vadd.f32 %v4382_v3, %v7152_v21  ;;  %v5978_v50 = vpop.f32.mrb[18].mxu0 }
 0x2fe   : > { %v6009_v14 = vadd.f32 %v5978_v50, %v7154_v25  ;;  %v4385_v11 = vpop.f32.mrb[19].mxu0 }
 0x2ff   : > { %v6010_v26 = vadd.f32 %v4385_v11, %v7156_v47 }
 0x300   : > { %v5185_v43 = vpack.c.bf16 %v6009_v14, %v6007_v37 }
 0x301   : > { %v5180_v57 = vpack.c.bf16 %v6010_v26, %v6008_v0 }
 0x302   : > { %5240 = vst [vmem:[%s7187_s14 + $0x48] sm:$0xff] %v5185_v43  }
 0x303   : > { %5239 = vst [vmem:[%s7187_s14 + $0x40] sm:$0xff] %v5180_v57   ;;  %v5981_v58 = vpop.f32.mrb[20].mxu0 }
 0x304   : > { %v6011_v39 = vadd.f32 %v5981_v58, %v7158_v27  ;;  %v4398_v54 = vpop.f32.mrb[21].mxu0 }
 0x305   : > { %v6012_v17 = vadd.f32 %v4398_v54, %v7160_v29  ;;  %v5982_v56 = vpop.f32.mrb[22].mxu0 }
 0x306   : > { %v6013_v21 = vadd.f32 %v5982_v56, %v7162_v32  ;;  %v4401_v59 = vpop.f32.mrb[23].mxu0 }
 0x307   : > { %v6014_v25 = vadd.f32 %v4401_v59, %v7164_v35 }
 0x308   : > { %v5195_v47 = vpack.c.bf16 %v6013_v21, %v6011_v39 }
 0x309   : > { %v5190_v30 = vpack.c.bf16 %v6014_v25, %v6012_v17 }
 0x30a   : > { %5242 = vst [vmem:[%s7187_s14 + $0x58] sm:$0xff] %v5195_v47  }
 0x30b   : > { %5241 = vst [vmem:[%s7187_s14 + $0x50] sm:$0xff] %v5190_v30   ;;  %v5985_v45 = vpop.f32.mrb[24].mxu0 }
 0x30c   : > { %v6015_v1 = vadd.f32 %v5985_v45, %v7166_v42  ;;  %v4414_v33 = vpop.f32.mrb[25].mxu0 }
 0x30d   : > { %v6016_v27 = vadd.f32 %v4414_v33, %v7168_v40  ;;  %v5986_v24 = vpop.f32.mrb[26].mxu0 }
 0x30e   : > { %v6017_v29 = vadd.f32 %v5986_v24, %v7170_v13  ;;  %v4417_v63 = vpop.f32.mrb[27].mxu0 }
 0x30f   : > { %v6018_v32 = vadd.f32 %v4417_v63, %v7172_v18 }
 0x310   : > { %v5205_v35 = vpack.c.bf16 %v6017_v29, %v6015_v1 }
 0x311   : > { %v5200_v6 = vpack.c.bf16 %v6018_v32, %v6016_v27 }
 0x312   : > { %5244 = vst [vmem:[%s7187_s14 + $0x68] sm:$0xff] %v5205_v35  }
 0x313   : > { %5243 = vst [vmem:[%s7187_s14 + $0x60] sm:$0xff] %v5200_v6   ;;  %v5989_v44 = vpop.f32.mrb[28].mxu0 }
 0x314   : > { %v6019_v51 = vadd.f32 %v5989_v44, %v7174_v41  ;;  %v4430_v20 = vpop.f32.mrb[29].mxu0 }
 0x315   : > { %v6020_v42 = vadd.f32 %v4430_v20, %v7176_v46  ;;  %v5990_v23 = vpop.f32.mrb[30].mxu0 }
 0x316   : > { %v6021_v40 = vadd.f32 %v5990_v23, %v7178_v48  ;;  %v4433_v16 = vpop.f32.mrb[31].mxu0 }
 0x317   : > { %v6022_v13 = vadd.f32 %v4433_v16, %v7180_v53 }
 0x318   : > { %v5215_v22 = vpack.c.bf16 %v6021_v40, %v6019_v51 }
 0x319   : > { %v5210_v36 = vpack.c.bf16 %v6022_v13, %v6020_v42 }
 0x31a   : > { %5246 = vst [vmem:[%s7187_s14 + $0x78] sm:$0xff] %v5215_v22  }
 0x31b   : > { %5245 = vst [vmem:[%s7187_s14 + $0x70] sm:$0xff] %v5210_v36  }
 0x31c PF: > { %s17_s24 = sadd.s32 1, %s6352_s24  }
 0x31d   : > { %p14_p4 = scmp.ge.s32.totalorder %s17_s24, 4  }
 0x31f   :  { %16 = sbr.rel (!%p14_p4) target bundleno = 1 (0x1), region = 90 }

</bundles_post_ra>
